<compile_context>
chip_gen: v7x
topology: tpu7x:2x2x1
jax: 0.10.0
libtpu: 0.0.40
codegen_flags: <defaults>
</compile_context>

<pallas_src>
import functools

import jax
import jax.numpy as jnp
from jax.experimental import pallas as pl
from jax.experimental.pallas import tpu as pltpu

INPUT_SIZE = 784
HIDDEN_SIZE = 512
OUTPUT_SIZE = 10
N_PAD = 128  # lane-dense padded output width for layer 3


def mlp_kernel(x_ref, w1_ref, b1_ref, w2_ref, b2_ref, w3_ref, b3_ref, o_ref):
    # Cast the streamed f32 activations to the weight dtype in VMEM (no extra HBM pass).
    x = x_ref[...].astype(w1_ref.dtype)
    # Layer 1: Linear(784 -> 512) + ReLU (MXU matmul, f32 accumulate, f32 epilogue).
    h1 = jnp.dot(x, w1_ref[...], preferred_element_type=jnp.float32)
    h1 = jnp.maximum(h1 + b1_ref[...], 0.0)
    # Layer 2: Linear(512 -> 512) + ReLU.
    h2 = jnp.dot(h1.astype(w2_ref.dtype), w2_ref[...], preferred_element_type=jnp.float32)
    h2 = jnp.maximum(h2 + b2_ref[...], 0.0)
    # Layer 3: Linear(512 -> 128). Columns >= 10 come from zero-padded W3/b3 (exact zeros).
    logits = jnp.dot(h2.astype(w3_ref.dtype), w3_ref[...], preferred_element_type=jnp.float32)
    o_ref[...] = (logits + b3_ref[...]).astype(o_ref.dtype)


def prepare_params(w1, b1, w2, b2, w3, b3, weight_dtype=jnp.bfloat16):
    """One-time parameter prep (hoisted out of the per-call forward).

    Weights stored (in_features, out_features). bf16 is the default on all TPU
    generations (v5e/v6e/v7x): halves weight HBM traffic and MXU passes; the f32
    bias-add/ReLU epilogue and f32 accumulation keep accuracy.
    """
    wd = jnp.float32 if weight_dtype is None else weight_dtype
    w1p = w1.astype(wd)                                                   # (784, 512)
    w2p = w2.astype(wd)                                                   # (512, 512)
    w3p = jnp.zeros((HIDDEN_SIZE, N_PAD), wd).at[:, :OUTPUT_SIZE].set(w3.astype(wd))
    b1r = b1.reshape(1, -1).astype(jnp.float32)                           # (1, 512)
    b2r = b2.reshape(1, -1).astype(jnp.float32)                           # (1, 512)
    b3r = jnp.zeros((1, N_PAD), jnp.float32).at[0, :OUTPUT_SIZE].set(b3.astype(jnp.float32))
    return w1p, b1r, w2p, b2r, w3p, b3r


def _choose_batch_tile(batch, cap):
    """Multiple of 8, <= cap, and (when batch allows) <= ceil(batch/2) so that
    grid = cdiv(batch, tile) >= 2 and both v7x TensorCores get work."""
    if batch <= 8:
        return 8
    half = -(-batch // 2)        # ceil(batch / 2)
    half = -(-half // 8) * 8     # round up to a multiple of 8 (sublane granularity)
    return int(max(8, min(cap, half)))


@functools.partial(jax.jit, static_argnames=("batch_tile",))
def mnist_linear_forward(x, w1p, b1r, w2p, b2r, w3p, b3r, *, batch_tile=256):
    """x: (B, 784) f32. Params from prepare_params(). Returns (B, 10) f32 logits."""
    B, D_in = x.shape
    assert D_in == INPUT_SIZE

    tile = _choose_batch_tile(B, batch_tile)
    num_tiles = pl.cdiv(B, tile)

    # Resident operands: constant index_map + single buffer (no double-buffer needed).
    def resident(shape):
        return pl.BlockSpec(shape, lambda i: (0, 0), pipeline_mode=pl.Buffered(1))

    itemsize = jnp.dtype(x.dtype).itemsize
    w_bytes = sum(int(a.size) * jnp.dtype(a.dtype).itemsize
                  for a in (w1p, b1r, w2p, b2r, w3p, b3r))
    cost = pl.CostEstimate(
        flops=2 * B * (INPUT_SIZE * HIDDEN_SIZE + HIDDEN_SIZE * HIDDEN_SIZE
                       + HIDDEN_SIZE * N_PAD),
        transcendentals=0,
        bytes_accessed=B * INPUT_SIZE * itemsize + w_bytes + B * N_PAD * 4,
    )

    out_padded = pl.pallas_call(
        mlp_kernel,
        out_shape=jax.ShapeDtypeStruct((B, N_PAD), jnp.float32),
        grid_spec=pltpu.PrefetchScalarGridSpec(
            num_scalar_prefetch=0,
            grid=(num_tiles,),
            in_specs=[
                pl.BlockSpec((tile, INPUT_SIZE), lambda i: (i, 0)),  # x tile (f32 stream)
                resident((INPUT_SIZE, HIDDEN_SIZE)),                 # W1
                resident((1, HIDDEN_SIZE)),                          # b1
                resident((HIDDEN_SIZE, HIDDEN_SIZE)),                # W2
                resident((1, HIDDEN_SIZE)),                          # b2
                resident((HIDDEN_SIZE, N_PAD)),                      # W3 (lane-padded)
                resident((1, N_PAD)),                                # b3 (lane-padded)
            ],
            out_specs=pl.BlockSpec((tile, N_PAD), lambda i: (i, 0)),
        ),
        compiler_params=pltpu.CompilerParams(
            dimension_semantics=("parallel",),  # shard batch tiles across v7x TensorCores
        ),
        cost_estimate=cost,
    )(x, w1p, b1r, w2p, b2r, w3p, b3r)

    # Strip only the lane padding of the logits (no batch padding was added).
    return out_padded[:, :OUTPUT_SIZE]


def init_params(key, dtype=jnp.float32):
    """Deterministic init mimicking torch.nn.Linear (uniform +-1/sqrt(fan_in)).
    Weights are kept as (in_features, out_features)."""
    ks = jax.random.split(key, 6)

    def linear_init(kw, kb, fan_in, fan_out):
        bound = 1.0 / jnp.sqrt(jnp.array(fan_in, dtype=jnp.float32))
        w = jax.random.uniform(kw, (fan_in, fan_out), dtype, -bound, bound)
        b = jax.random.uniform(kb, (fan_out,), dtype, -bound, bound)
        return w, b

    w1, b1 = linear_init(ks[0], ks[1], INPUT_SIZE, HIDDEN_SIZE)
    w2, b2 = linear_init(ks[2], ks[3], HIDDEN_SIZE, HIDDEN_SIZE)
    w3, b3 = linear_init(ks[4], ks[5], HIDDEN_SIZE, OUTPUT_SIZE)
    return w1, b1, w2, b2, w3, b3


def reference_forward(x, w1, b1, w2, b2, w3, b3):
    h1 = jnp.maximum(x @ w1 + b1, 0.0)
    h2 = jnp.maximum(h1 @ w2 + b2, 0.0)
    return h2 @ w3 + b3


def reference_forward_bf16(x, w1, b1, w2, b2, w3, b3):
    """Matches the kernel's bf16-weight path (bf16 operands, f32 accumulate, f32 epilogue)."""
    bf = jnp.bfloat16
    h1 = jnp.maximum(
        jnp.dot(x.astype(bf), w1.astype(bf), preferred_element_type=jnp.float32) + b1, 0.0)
    h2 = jnp.maximum(
        jnp.dot(h1.astype(bf), w2.astype(bf), preferred_element_type=jnp.float32) + b2, 0.0)
    return jnp.dot(h2.astype(bf), w3.astype(bf), preferred_element_type=jnp.float32) + b3


if __name__ == "__main__":
    key = jax.random.PRNGKey(0)
    k_x, k_p = jax.random.split(key)

    # Small batch; deliberately not a multiple of 8 to exercise the masked partial
    # last batch tile (no wrapper-side batch padding).
    B = 13
    x = jax.random.normal(k_x, (B, INPUT_SIZE), jnp.float32)
    raw_params = init_params(k_p)

    # Default (bf16-weight) path — compared against a matching bf16 reference.
    params_bf16 = prepare_params(*raw_params)  # weight_dtype defaults to bfloat16
    out_bf16 = jax.block_until_ready(mnist_linear_forward(x, *params_bf16))
    ref_bf16 = reference_forward_bf16(x, *raw_params)
    assert out_bf16.shape == (B, OUTPUT_SIZE)
    assert out_bf16.dtype == jnp.float32
    assert jnp.allclose(out_bf16, ref_bf16, atol=2e-2, rtol=2e-2), "bf16 mismatch vs reference"

    # Full f32 path — compared against the exact f32 reference.
    params_f32 = prepare_params(*raw_params, weight_dtype=jnp.float32)
    out_f32 = jax.block_until_ready(mnist_linear_forward(x, *params_f32))
    ref_f32 = reference_forward(x, *raw_params)
    assert out_f32.shape == (B, OUTPUT_SIZE)
    assert jnp.allclose(out_f32, ref_f32, atol=1e-3, rtol=1e-3), "f32 mismatch vs reference"

    print("KERNEL_OK")
</pallas_src>

<mosaic_0001>
module attributes {stable_mosaic.version = 11 : i64} {
  func.func @mlp_kernel(%arg0: i32, %arg1: memref<8x784xf32, #tpu.memory_space<vmem>>, %arg2: memref<784x512xbf16, #tpu.memory_space<vmem>>, %arg3: memref<1x512xf32, #tpu.memory_space<vmem>>, %arg4: memref<512x512xbf16, #tpu.memory_space<vmem>>, %arg5: memref<1x512xf32, #tpu.memory_space<vmem>>, %arg6: memref<512x128xbf16, #tpu.memory_space<vmem>>, %arg7: memref<1x128xf32, #tpu.memory_space<vmem>>, %arg8: memref<8x128xf32, #tpu.memory_space<vmem>>) attributes {dimension_semantics = [#tpu.dimension_semantics<parallel>], iteration_bounds = array<i64: 2>, scalar_prefetch = 0 : i64, scratch_operands = 0 : i64, tpu.core_type = #tpu.core_type<tc>, window_params = [{transform_indices = @transform_0, window_bounds = array<i64: 8, 784>}, {pipeline_mode = #tpu.pipeline_mode<synchronous>, transform_indices = @transform_1, window_bounds = array<i64: 784, 512>}, {pipeline_mode = #tpu.pipeline_mode<synchronous>, transform_indices = @transform_2, window_bounds = array<i64: 1, 512>}, {pipeline_mode = #tpu.pipeline_mode<synchronous>, transform_indices = @transform_3, window_bounds = array<i64: 512, 512>}, {pipeline_mode = #tpu.pipeline_mode<synchronous>, transform_indices = @transform_4, window_bounds = array<i64: 1, 512>}, {pipeline_mode = #tpu.pipeline_mode<synchronous>, transform_indices = @transform_5, window_bounds = array<i64: 512, 128>}, {pipeline_mode = #tpu.pipeline_mode<synchronous>, transform_indices = @transform_6, window_bounds = array<i64: 1, 128>}, {transform_indices = @transform_7, window_bounds = array<i64: 8, 128>}]} {
    %c0 = arith.constant 0 : index
    %c0_0 = arith.constant 0 : index
    %0 = vector.load %arg1[%c0, %c0_0] : memref<8x784xf32, #tpu.memory_space<vmem>>, vector<8x784xf32>
    %1 = arith.truncf %0 : vector<8x784xf32> to vector<8x784xbf16>
    %c0_1 = arith.constant 0 : index
    %c0_2 = arith.constant 0 : index
    %2 = vector.load %arg2[%c0_1, %c0_2] : memref<784x512xbf16, #tpu.memory_space<vmem>>, vector<784x512xbf16>
    %cst = arith.constant dense<0.000000e+00> : vector<8x512xf32>
    %3 = tpu.matmul %1, %2, %cst {dimension_numbers = #tpu.dot_dimension_numbers<[1], [0], [0], [1], [0, 0, 1, 1], [], []>} : vector<8x784xbf16>, vector<784x512xbf16>, vector<8x512xf32> -> vector<8x512xf32>
    %c0_3 = arith.constant 0 : index
    %c0_4 = arith.constant 0 : index
    %4 = vector.load %arg3[%c0_3, %c0_4] : memref<1x512xf32, #tpu.memory_space<vmem>>, vector<1x512xf32>
    %5 = vector.broadcast %4 : vector<1x512xf32> to vector<8x512xf32>
    %6 = arith.addf %3, %5 : vector<8x512xf32>
    %cst_5 = arith.constant 0.000000e+00 : f32
    %7 = vector.broadcast %cst_5 : f32 to vector<8x512xf32>
    %8 = arith.maximumf %6, %7 : vector<8x512xf32>
    %9 = arith.truncf %8 : vector<8x512xf32> to vector<8x512xbf16>
    %c0_6 = arith.constant 0 : index
    %c0_7 = arith.constant 0 : index
    %10 = vector.load %arg4[%c0_6, %c0_7] : memref<512x512xbf16, #tpu.memory_space<vmem>>, vector<512x512xbf16>
    %cst_8 = arith.constant dense<0.000000e+00> : vector<8x512xf32>
    %11 = tpu.matmul %9, %10, %cst_8 {dimension_numbers = #tpu.dot_dimension_numbers<[1], [0], [0], [1], [0, 0, 1, 1], [], []>} : vector<8x512xbf16>, vector<512x512xbf16>, vector<8x512xf32> -> vector<8x512xf32>
    %c0_9 = arith.constant 0 : index
    %c0_10 = arith.constant 0 : index
    %12 = vector.load %arg5[%c0_9, %c0_10] : memref<1x512xf32, #tpu.memory_space<vmem>>, vector<1x512xf32>
    %13 = vector.broadcast %12 : vector<1x512xf32> to vector<8x512xf32>
    %14 = arith.addf %11, %13 : vector<8x512xf32>
    %cst_11 = arith.constant 0.000000e+00 : f32
    %15 = vector.broadcast %cst_11 : f32 to vector<8x512xf32>
    %16 = arith.maximumf %14, %15 : vector<8x512xf32>
    %17 = arith.truncf %16 : vector<8x512xf32> to vector<8x512xbf16>
    %c0_12 = arith.constant 0 : index
    %c0_13 = arith.constant 0 : index
    %18 = vector.load %arg6[%c0_12, %c0_13] : memref<512x128xbf16, #tpu.memory_space<vmem>>, vector<512x128xbf16>
    %cst_14 = arith.constant dense<0.000000e+00> : vector<8x128xf32>
    %19 = tpu.matmul %17, %18, %cst_14 {dimension_numbers = #tpu.dot_dimension_numbers<[1], [0], [0], [1], [0, 0, 1, 1], [], []>} : vector<8x512xbf16>, vector<512x128xbf16>, vector<8x128xf32> -> vector<8x128xf32>
    %c0_15 = arith.constant 0 : index
    %c0_16 = arith.constant 0 : index
    %20 = vector.load %arg7[%c0_15, %c0_16] : memref<1x128xf32, #tpu.memory_space<vmem>>, vector<1x128xf32>
    %21 = vector.broadcast %20 : vector<1x128xf32> to vector<8x128xf32>
    %22 = arith.addf %19, %21 : vector<8x128xf32>
    %c0_17 = arith.constant 0 : index
    %c0_18 = arith.constant 0 : index
    %23 = vector.load %arg8[%c0_17, %c0_18] : memref<8x128xf32, #tpu.memory_space<vmem>>, vector<8x128xf32>
    tpu.vector_store %arg8[%c0_17, %c0_18], %22 {strides = array<i32>} : memref<8x128xf32, #tpu.memory_space<vmem>>, vector<8x128xf32>,
    return
  }
  func.func @transform_0(%arg0: i32) -> (i32, i32) {
    %c0_i32 = arith.constant 0 : i32
    %c0_i32_0 = arith.constant 0 : i32
    return %arg0, %c0_i32 : i32, i32
  }
  func.func @transform_1(%arg0: i32) -> (i32, i32) {
    %c0_i32 = arith.constant 0 : i32
    %c0_i32_0 = arith.constant 0 : i32
    %c0_i32_1 = arith.constant 0 : i32
    return %c0_i32, %c0_i32_0 : i32, i32
  }
  func.func @transform_2(%arg0: i32) -> (i32, i32) {
    %c0_i32 = arith.constant 0 : i32
    %c0_i32_0 = arith.constant 0 : i32
    %c0_i32_1 = arith.constant 0 : i32
    return %c0_i32, %c0_i32_0 : i32, i32
  }
  func.func @transform_3(%arg0: i32) -> (i32, i32) {
    %c0_i32 = arith.constant 0 : i32
    %c0_i32_0 = arith.constant 0 : i32
    %c0_i32_1 = arith.constant 0 : i32
    return %c0_i32, %c0_i32_0 : i32, i32
  }
  func.func @transform_4(%arg0: i32) -> (i32, i32) {
    %c0_i32 = arith.constant 0 : i32
    %c0_i32_0 = arith.constant 0 : i32
    %c0_i32_1 = arith.constant 0 : i32
    return %c0_i32, %c0_i32_0 : i32, i32
  }
  func.func @transform_5(%arg0: i32) -> (i32, i32) {
    %c0_i32 = arith.constant 0 : i32
    %c0_i32_0 = arith.constant 0 : i32
    %c0_i32_1 = arith.constant 0 : i32
    return %c0_i32, %c0_i32_0 : i32, i32
  }
  func.func @transform_6(%arg0: i32) -> (i32, i32) {
    %c0_i32 = arith.constant 0 : i32
    %c0_i32_0 = arith.constant 0 : i32
    %c0_i32_1 = arith.constant 0 : i32
    return %c0_i32, %c0_i32_0 : i32, i32
  }
  func.func @transform_7(%arg0: i32) -> (i32, i32) {
    %c0_i32 = arith.constant 0 : i32
    %c0_i32_0 = arith.constant 0 : i32
    return %arg0, %c0_i32 : i32, i32
  }
}

</mosaic_0001>

<bundles_post_ra>
// kernel: mnist_linear_forward.1
= control target key start
LH: loop header
LB: loop body
LE: loop exit
PB: predicated region body
PF: predicated region fallthrough
CT: control target
= control target key end

     0   :  { %12 = vsyncpa [#allocation3], 0  ;;  %s4917_s0 = inlined_call_operand.hbm [shape: f32[13,784], index: 0, kind: input, shape index: {}]   ;;  %s4918_s1 = inlined_call_operand.hbm [shape: bf16[784,512], index: 1, kind: input, shape index: {}]   ;;  %s4919_s2 = inlined_call_operand.vmem [shape: f32[1,512], index: 2, kind: input, shape index: {}]   ;;  %s4920_s3 = inlined_call_operand.hbm [shape: bf16[512,512], index: 3, kind: input, shape index: {}]   ;;  %s4921_s4 = inlined_call_operand.vmem [shape: f32[1,512], index: 4, kind: input, shape index: {}]   ;;  %s4922_s5 = inlined_call_operand.hbm [shape: bf16[512,128], index: 5, kind: input, shape index: {}]   ;;  %s4923_s6 = inlined_call_operand.vmem [shape: f32[1,128], index: 6, kind: input, shape index: {}]   ;;  %s4924_s7 = inlined_call_operand.hbm [shape: f32[13,128], index: 7, kind: output, shape index: {}]  }
   0x1   :  { %14 = vsyncpa [#allocation3 + $0x1], 0 }
   0x2   :  { %15 = vsyncpa [#allocation6], 0 }
   0x3   :  { %16 = vsyncpa [#allocation9], 0 }
   0x4   :  { %17 = vsyncpa [#allocation4], 0 }
   0x5   :  { %19 = vsyncpa [#allocation4 + $0x1], 0  ;;  %s4613_s24 = smov 0   ;;  %s4615_s25 = smov 0  }
   0x6   :  { %s4617_s26 = smov 0   ;;  %s4619_s27 = smov 0  }
   0x7 LB: > { %s4634_s28 = sadd.s32 4294967295, %s4561_s27   ;;  %s3311_s29 = sadd.s32 4294967294, %s4561_s27   ;;  %s4561_s27 = sphi %s4619_s27, %s4950_s27   ;;  %s4557_s26 = sphi %s4617_s26, %s4949_s26   ;;  %s4553_s25 = sphi %s4615_s25, %s4948_s25   ;;  %s4549_s24 = sphi %s4613_s24, %s4947_s24  }
   0x8   : > { %p45_p0 = scmp.ne.s32.totalorder %s4553_s25, %s4549_s24  ;;  %p4925_p1 = scmp.eq.s32.totalorder %s4634_s28, 0 }
   0x9   : > { %p201_p3 = scmp.eq.s32.totalorder %s3311_s29, 1  ;;  %p3312_p5 = scmp.ge.s32.totalorder %s4561_s27, 1 }
   0xa   : > { %p4643_p4 = por %p4925_p1, %p45_p0  ;;  %p208_p7 = scmp.lt.s32.totalorder %s4561_s27, 3 }
   0xb   : > { %p4648_p6 = por %p201_p3, %p45_p0  ;;  %s4563_s10 = smov [#allocation5]  }
   0xc   : > { %s4929_s30 = scalar_select %p4643_p4, 1, 0 }
   0xd   : > { %s4930_s8 = scalar_select %p4648_p6, 1, 0 }
   0xe   : > { %p4653_p8 = pnand %p3312_p5, %p208_p7  ;;  %s220_s11 = sshll.u32 %s4563_s10, 4  ;;  %s4657_s11 = int_to_ptr.vmem [resolvable:$true] %s220_s11 }
   0xf   : > { %4931 = sst [smem:[#allocation15_spill]] %s4930_s8  ;;  %s4564_s13 = smov [#allocation7]  }
  0x10   : > { %s4932_s9 = scalar_select %p4653_p8, 1, 0 }
  0x11   : > { %p3789_p9 = pneg %p4653_p8  ;;  %s236_s14 = sshll.u32 %s4564_s13, 4  ;;  %s4668_s14 = int_to_ptr.vmem [resolvable:$true] %s236_s14 }
  0x12   : > { %s4565_s15 = smov [#allocation8]   ;;  %s4373_s19 = scalar_lea.hbm %s4918_s1, 25088 }
  0x13   : > { %p4664_p11 = pnand %p3789_p9, %p4925_p1  ;;  %s4670_s16 = sshll.u32 %s4565_s15, 4  ;;  %s253_s16 = int_to_ptr.vmem [resolvable:$true] %s4670_s16 }
  0x14   : > { %p4374_p12 = scmp.ne.s32.totalorder %s4918_s1, %s4373_s19  ;;  %p4380_p5 = scmp.lt.u32.totalorder %s4373_s19, %s4918_s1 }
  0x15   : > { %p4680_p13 = pneg %p4664_p11 }
  0x17   : > { %p4376_p0 = pnand %p4680_p13, %p4374_p12 }
  0x19   : > { %p4377_p3 = pneg %p4376_p0 }
  0x1b   : > { %p4382_p7 = pnand %p4380_p5, %p4377_p3 }
  0x1d   : > { %4385 = shalt.err (!%p4382_p7)
}
  0x1e   : > { %s4386_s10 = scalar_lea.vmem %s4657_s11, 25088  ;;  %p4394_p2 = scmp.lt.s32.totalorder %s4657_s11, %s4657_s11 }
  0x1f   : > { %p4387_p9 = scmp.ne.s32.totalorder %s4657_s11, %s4386_s10  ;;  %p4395_p6 = scmp.lt.s32.totalorder %s4386_s10, %s4386_s10 }
  0x21   : > { %p4389_p10 = pnand %p4387_p9, %p4680_p13  ;;  %p4396_p12 = por %p4395_p6, %p4394_p2 }
  0x23   : > { %p4390_p1 = pneg %p4389_p10 }
  0x25   : > { %p4397_p0 = pnand %p4396_p12, %p4390_p1 }
  0x27   : > { %4400 = shalt.err (!%p4397_p0)
}
  0x28   : > { %s4566_s13 = smov 256   ;;  %s4567_s15 = smov 16  }
  0x29   : > { %3792 = dma.hbm_to_vmem [thread:$0]  (!%p4664_p11), %s4918_s1, 25088, %s4657_s11, [#allocation6], %s4566_s13, %s4566_s13, %s4567_s15  }
  0x2a   : > { %s4401_s21 = scalar_lea.hbm %s4920_s3, 16384 }
  0x2b   : > { %p4402_p2 = scmp.ne.s32.totalorder %s4920_s3, %s4401_s21  ;;  %p4408_p10 = scmp.lt.u32.totalorder %s4401_s21, %s4920_s3 }
  0x2d   : > { %p4404_p1 = pnand %p4402_p2, %p4680_p13 }
  0x2f   : > { %p4405_p6 = pneg %p4404_p1 }
  0x31   : > { %p4410_p3 = pnand %p4408_p10, %p4405_p6 }
  0x33   : > { %4413 = shalt.err (!%p4410_p3)
}
  0x34   : > { %s4414_s11 = scalar_lea.vmem %s4668_s14, 16384  ;;  %p4422_p12 = scmp.lt.s32.totalorder %s4668_s14, %s4668_s14 }
  0x35   : > { %p4415_p5 = scmp.ne.s32.totalorder %s4668_s14, %s4414_s11  ;;  %p4423_p0 = scmp.lt.s32.totalorder %s4414_s11, %s4414_s11 }
  0x37   : > { %p4417_p7 = pnand %p4415_p5, %p4680_p13  ;;  %p4424_p2 = por %p4423_p0, %p4422_p12 }
  0x39   : > { %p4418_p9 = pneg %p4417_p7 }
  0x3b   : > { %p4425_p1 = pnand %p4424_p2, %p4418_p9 }
  0x3d   : > { %4428 = shalt.err (!%p4425_p1)
}
  0x3e   : > { %3795 = dma.hbm_to_vmem [thread:$0]  (!%p4664_p11), %s4920_s3, 16384, %s4668_s14, [#allocation6], %s4566_s13, %s4566_s13, %s4567_s15  }
  0x3f   : > { %s4429_s20 = scalar_lea.hbm %s4922_s5, 4096 }
  0x40   : > { %p4430_p6 = scmp.ne.s32.totalorder %s4922_s5, %s4429_s20  ;;  %p4436_p5 = scmp.lt.u32.totalorder %s4429_s20, %s4922_s5 }
  0x42   : > { %p4432_p10 = pnand %p4430_p6, %p4680_p13 }
  0x44   : > { %p4433_p3 = pneg %p4432_p10 }
  0x46   : > { %p4438_p7 = pnand %p4436_p5, %p4433_p3 }
  0x48   : > { %4441 = shalt.err (!%p4438_p7)
}
  0x49   : > { %s4442_s11 = scalar_lea.vmem %s253_s16, 4096  ;;  %p4450_p2 = scmp.lt.s32.totalorder %s253_s16, %s253_s16 }
  0x4a   : > { %p4443_p9 = scmp.ne.s32.totalorder %s253_s16, %s4442_s11  ;;  %p4451_p1 = scmp.lt.s32.totalorder %s4442_s11, %s4442_s11 }
  0x4c   : > { %p4445_p12 = pnand %p4443_p9, %p4680_p13  ;;  %p4452_p4 = por %p4451_p1, %p4450_p2 }
  0x4e   : > { %p4446_p0 = pneg %p4445_p12 }
  0x50   : > { %p4453_p8 = pnand %p4452_p4, %p4446_p0 }
  0x52   : > { %4456 = shalt.err (!%p4453_p8)
}
  0x53   : > { %s4568_s14 = smov 64   ;;  %s4569_s22 = smov 4  }
  0x54   : > { %3798 = dma.hbm_to_vmem [thread:$0]  (!%p4664_p11), %s4922_s5, 4096, %s253_s16, [#allocation9], %s4568_s14, %s4568_s14, %s4569_s22  }
  0x55   : > { %s4744_s8 = sadd.s32 1, %s4561_s27   ;;  %s32_s18 = sadd.s32 1, %s4557_s26 }
  0x56   : > { %s29_s17 = ssub.s32 %s4561_s27, %s4744_s8  ;;  %p39_p8 = scmp.ne.s32.totalorder %s4557_s26, %s4553_s25 }
  0x57   : > { %p30_p4 = scmp.eq.s32.totalorder %s29_s17, 0  ;;  %p40_p13 = scmp.eq.s32.totalorder %s4561_s27, 0 }
  0x58   : > { %p3810_p6 = scmp.lt.s32.totalorder %s4561_s27, 2  ;;  %p4935_p3 = scmp.eq.s32.totalorder %s4634_s28, 1 }
  0x59   : > { %s4754_s19 = scalar_select %p30_p4, %s4557_s26, %s32_s18  }
  0x5a   : > { %p41_p10 = por %p40_p13, %p39_p8  ;;  %p4758_p5 = por %p4935_p3, %p39_p8 }
  0x5b   : > { %s269_s12 = sand.u32 1, %s4557_s26   ;;  %s3771_s21 = smul.u32 896, %s4561_s27 }
  0x5c   : > { %s3770_s16 = smul.u32 56, %s269_s12  ;;  %p4764_p11 = pnand %p3810_p6, %p41_p10 }
  0x5d   : > { %s4771_s11 = scalar_lea.hbm %s4917_s0, %s3771_s21  ;;  %s270_s13 = scalar_lea.sflag [#allocation3], %s269_s12 }
  0x5e   : > { %s273_s14 = scalar_lea.vmem [#allocation2], %s3770_s16  ;;  %s4457_s15 = scalar_lea.hbm %s4771_s11, 896 }
  0x5f   : > { %s281_s22 = sshll.u32 %s273_s14, 4  ;;  %p4458_p7 = scmp.ne.s32.totalorder %s4771_s11, %s4457_s15  ;;  %s4773_s22 = int_to_ptr.vmem [resolvable:$true] %s281_s22 }
  0x60   : > { %p4459_p9 = pneg %p4764_p11  ;;  %s4462_s21 = scalar_lea.hbm %s4917_s0, 1792 }
  0x61   : > { %p4463_p2 = scmp.lt.u32.totalorder %s4771_s11, %s4917_s0  ;;  %p4464_p1 = scmp.lt.u32.totalorder %s4462_s21, %s4457_s15 }
  0x62   : > { %p4460_p12 = pnand %p4459_p9, %p4458_p7  ;;  %p4466_p8 = scmp.lt.u32.totalorder %s4457_s15, %s4771_s11 }
  0x63   : > { %p4465_p4 = por %p4464_p1, %p4463_p2 }
  0x64   : > { %p4461_p0 = pneg %p4460_p12 }
  0x65   : > { %p4467_p13 = por %p4466_p8, %p4465_p4 }
  0x67   : > { %p4468_p6 = pnand %p4467_p13, %p4461_p0 }
  0x69   : > { %4471 = shalt.err (!%p4468_p6)
}
  0x6a   : > { %s4472_s12 = scalar_lea.vmem %s4773_s22, 896  ;;  %s4570_s16 = smov [#allocation2]  }
  0x6b   : > { %p4473_p10 = scmp.ne.s32.totalorder %s4773_s22, %s4472_s12  ;;  %s4477_s14 = sshll.u32 %s4570_s16, 4  ;;  %s4478_s14 = int_to_ptr.vmem [resolvable:$false] %s4477_s14 }
  0x6c   : > { %s4479_s17 = scalar_lea.vmem %s4478_s14, 1792  ;;  %p4480_p12 = scmp.lt.s32.totalorder %s4773_s22, %s4478_s14 }
  0x6d   : > { %p4475_p3 = pnand %p4473_p10, %p4459_p9  ;;  %p4481_p2 = scmp.lt.s32.totalorder %s4479_s17, %s4472_s12 }
  0x6f   : > { %p4476_p7 = pneg %p4475_p3  ;;  %p4482_p1 = por %p4481_p2, %p4480_p12 }
  0x71   : > { %p4483_p4 = pnand %p4482_p1, %p4476_p7 }
  0x73   : > { %4486 = shalt.err (!%p4483_p4)
}
  0x74   : > { %3802 = dma.hbm_to_vmem [thread:$0]  (!%p4764_p11), %s4771_s11, 896, %s4773_s22, %s270_s13  }
  0x75   : > { %p4938_p0 = scmp.ne.s32.totalorder %s4932_s9, 0 }
  0x76   : > { %s4803_s15 = sand.u32 (!%p4938_p0), 1, %s4553_s25   ;;  %p4939_p9 = scmp.ne.s32.totalorder (!%p4938_p0), %s4929_s30, 0 }
  0x77   : > { %290 = sbr.rel (%p4938_p0) target bundleno = 1076 (0x434), region = 48  ;;  %s293_s21 = scalar_lea.sflag (!%p4938_p0), [#allocation3], %s4803_s15 }
  0x78   : > { %s3772_s18 = smul.u32 (!%p4938_p0), 56, %s4803_s15 }
  0x7a   : > { %s4807_s29 = scalar_lea.vmem (!%p4938_p0), [#allocation2], %s3772_s18 }
  0x7e   : > { %4532 = dma.done.wait (%p4939_p9), %s293_s21, 896  }
  0x7f   : > { %4534 = vsyncadd (%p4939_p9), %s293_s21, 4294966400  ;;  %p4940_p11 = scmp.eq.s32.totalorder %s4634_s28, 0 }
  0x81   : > { %4536 = dma.done.wait (%p4940_p11), [#allocation6], 41472   ;;  %p4941_p8 = pmov %p4940_p11 }
  0x83   : > { %4538 = vsyncadd (%p4941_p8), [#allocation6], 4294925824  ;;  %p4942_p13 = pmov %p4941_p8 }
  0x84   : > { %p4943_p6 = pmov %p4941_p8 }
  0x85   : > { %4540 = dma.done.wait (%p4942_p13), [#allocation9], 4096  }
  0x86   : > { %4542 = vsyncadd (%p4943_p6), [#allocation9], 4294963200  ;;  %v3855_v0 = vld [vmem:[#allocation5 + $0x4] ss:$16 sps:$4 sm:$0xff]   ;;  %v3857_v1 = vld [vmem:[#allocation5 + $0xc] ss:$16 sps:$4 sm:$0xff]  }
  0x87   : > { %1556 = vmatprep.subr.bf16.mxu0 %v3855_v0  ;;  %v3859_v2 = vld [vmem:[#allocation5] ss:$16 sps:$4 sm:$0xff]   ;;  %v3860_v3 = vld [vmem:[#allocation5 + $0x8] ss:$16 sps:$4 sm:$0xff]   ;;  %1720 = vmatprep.subr.bf16.mxu1 %v3857_v1  ;;  %v3861_v4 = vld [vmem:[#allocation5 + $0x24] ss:$16 sps:$4 sm:$0xff]  }
  0x88   : > { %1557 = vmatpush1.bf16.msra.mxu0 %v3859_v2  ;;  %1721 = vmatpush1.bf16.msra.mxu1 %v3860_v3  ;;  %v3863_v5 = vld [vmem:[#allocation5 + $0x2c] ss:$16 sps:$4 sm:$0xff]   ;;  %v3865_v6 = vld [vmem:[#allocation5 + $0x20] ss:$16 sps:$4 sm:$0xff]   ;;  %v3866_v7 = vld [vmem:[#allocation5 + $0x28] ss:$16 sps:$4 sm:$0xff]  }
  0x89   : > { %1558 = vmatprep.subr.bf16.mxu0 %v3861_v4  ;;  %1722 = vmatprep.subr.bf16.mxu1 %v3863_v5  ;;  %v3867_v8 = vld [vmem:[#allocation5 + $0x44] ss:$16 sps:$4 sm:$0xff]   ;;  %v3869_v9 = vld [vmem:[#allocation5 + $0x4c] ss:$16 sps:$4 sm:$0xff]   ;;  %v3871_v10 = vld [vmem:[#allocation5 + $0x40] ss:$16 sps:$4 sm:$0xff]  }
  0x8a   : > { %v3872_v11 = vld [vmem:[#allocation5 + $0x48] ss:$16 sps:$4 sm:$0xff]   ;;  %v3873_v12 = vld [vmem:[#allocation5 + $0x64] ss:$16 sps:$4 sm:$0xff]   ;;  %v3875_v13 = vld [vmem:[#allocation5 + $0x6c] ss:$16 sps:$4 sm:$0xff]  }
  0x8b   : > { %v3877_v14 = vld [vmem:[#allocation5 + $0x60] ss:$16 sps:$4 sm:$0xff]   ;;  %v3878_v15 = vld [vmem:[#allocation5 + $0x68] ss:$16 sps:$4 sm:$0xff]   ;;  %v3879_v16 = vld [vmem:[#allocation5 + $0x84] ss:$16 sps:$4 sm:$0xff]  }
  0x8c   : > { %1559 = vmatpush1.bf16.msra.mxu0 %v3865_v6  ;;  %1723 = vmatpush1.bf16.msra.mxu1 %v3866_v7  ;;  %v3881_v17 = vld [vmem:[#allocation5 + $0x8c] ss:$16 sps:$4 sm:$0xff]   ;;  %v3883_v18 = vld [vmem:[#allocation5 + $0x80] ss:$16 sps:$4 sm:$0xff]   ;;  %v3884_v19 = vld [vmem:[#allocation5 + $0x88] ss:$16 sps:$4 sm:$0xff]  }
  0x8d   : > { %1560 = vmatprep.subr.bf16.mxu0 %v3867_v8  ;;  %1724 = vmatprep.subr.bf16.mxu1 %v3869_v9  ;;  %v3885_v20 = vld [vmem:[#allocation5 + $0xa4] ss:$16 sps:$4 sm:$0xff]   ;;  %v3887_v21 = vld [vmem:[#allocation5 + $0xac] ss:$16 sps:$4 sm:$0xff]   ;;  %v3889_v22 = vld [vmem:[#allocation5 + $0xa0] ss:$16 sps:$4 sm:$0xff]  }
  0x8e   : > { %v3890_v23 = vld [vmem:[#allocation5 + $0xa8] ss:$16 sps:$4 sm:$0xff]   ;;  %v3891_v24 = vld [vmem:[#allocation5 + $0xc4] ss:$16 sps:$4 sm:$0xff]   ;;  %v3893_v25 = vld [vmem:[#allocation5 + $0xcc] ss:$16 sps:$4 sm:$0xff]  }
  0x8f   : > { %v3895_v26 = vld [vmem:[#allocation5 + $0xc0] ss:$16 sps:$4 sm:$0xff]   ;;  %v3896_v27 = vld [vmem:[#allocation5 + $0xc8] ss:$16 sps:$4 sm:$0xff]   ;;  %v3897_v28 = vld [vmem:[#allocation5 + $0xe4] ss:$16 sps:$4 sm:$0xff]  }
  0x90   : > { %1561 = vmatpush1.bf16.msra.mxu0 %v3871_v10  ;;  %1725 = vmatpush1.bf16.msra.mxu1 %v3872_v11  ;;  %v3899_v29 = vld [vmem:[#allocation5 + $0xec] ss:$16 sps:$4 sm:$0xff]   ;;  %v3901_v30 = vld [vmem:[#allocation5 + $0xe0] ss:$16 sps:$4 sm:$0xff]   ;;  %v3902_v31 = vld [vmem:[#allocation5 + $0xe8] ss:$16 sps:$4 sm:$0xff]  }
  0x91   : > { %1562 = vmatprep.subr.bf16.mxu0 %v3873_v12  ;;  %1726 = vmatprep.subr.bf16.mxu1 %v3875_v13  ;;  %v3903_v32 = vld [vmem:[#allocation5 + $0x104] ss:$16 sps:$4 sm:$0xff]   ;;  %v3905_v33 = vld [vmem:[#allocation5 + $0x10c] ss:$16 sps:$4 sm:$0xff]   ;;  %v3907_v34 = vld [vmem:[#allocation5 + $0x100] ss:$16 sps:$4 sm:$0xff]  }
  0x92   : > { %v3908_v35 = vld [vmem:[#allocation5 + $0x108] ss:$16 sps:$4 sm:$0xff]   ;;  %v3909_v36 = vld [vmem:[#allocation5 + $0x124] ss:$16 sps:$4 sm:$0xff]   ;;  %v3911_v37 = vld [vmem:[#allocation5 + $0x12c] ss:$16 sps:$4 sm:$0xff]  }
  0x93   : > { %v3913_v38 = vld [vmem:[#allocation5 + $0x120] ss:$16 sps:$4 sm:$0xff]   ;;  %v3914_v39 = vld [vmem:[#allocation5 + $0x128] ss:$16 sps:$4 sm:$0xff]   ;;  %v3915_v40 = vld [vmem:[#allocation5 + $0x144] ss:$16 sps:$4 sm:$0xff]  }
  0x94   : > { %1563 = vmatpush1.bf16.msra.mxu0 %v3877_v14  ;;  %1727 = vmatpush1.bf16.msra.mxu1 %v3878_v15  ;;  %v3917_v41 = vld [vmem:[#allocation5 + $0x14c] ss:$16 sps:$4 sm:$0xff]   ;;  %v3919_v42 = vld [vmem:[#allocation5 + $0x140] ss:$16 sps:$4 sm:$0xff]   ;;  %v3920_v43 = vld [vmem:[#allocation5 + $0x148] ss:$16 sps:$4 sm:$0xff]  }
  0x95   : > { %1564 = vmatprep.subr.bf16.mxu0 %v3879_v16  ;;  %1728 = vmatprep.subr.bf16.mxu1 %v3881_v17  ;;  %v3921_v44 = vld [vmem:[#allocation5 + $0x164] ss:$16 sps:$4 sm:$0xff]   ;;  %v3923_v45 = vld [vmem:[#allocation5 + $0x16c] ss:$16 sps:$4 sm:$0xff]   ;;  %v3925_v47 = vld [vmem:[#allocation5 + $0x160] ss:$16 sps:$4 sm:$0xff]  }
  0x96   : > { %v341_v46 = vld [vmem:[%s4807_s29 + $0x8] sm:$0xff]  ;;  %v340_v2 = vld [vmem:[%s4807_s29] sm:$0xff]  ;;  %vm1552_vm0 = vcmask 130048   ;;  %s3322_s22 = sshll.u32 %s4803_s15, 3  ;;  %s3683_s12 = sshll.u32 %s4634_s28, 7 }
  0x97   : > { %v348_v48 = vpack.c.bf16 %v341_v46, %v341_v46  ;;  %v3926_v49 = vld [vmem:[#allocation5 + $0x168] ss:$16 sps:$4 sm:$0xff]   ;;  %v3927_v50 = vld [vmem:[#allocation5 + $0x184] ss:$16 sps:$4 sm:$0xff]   ;;  %v3929_v51 = vld [vmem:[#allocation5 + $0x18c] ss:$16 sps:$4 sm:$0xff]   ;;  %v347_v5 = vpack.c.bf16 %v340_v2, %v340_v2  ;;  %s4873_s21 = scalar_lea.hbm %s4924_s7, %s3683_s12 }
  0x98   : > { %1565 = vmatpush1.bf16.msra.mxu0 %v3883_v18  ;;  %1729 = vmatpush1.bf16.msra.mxu1 %v3884_v19  ;;  %v3931_v52 = vld [vmem:[#allocation5 + $0x180] ss:$16 sps:$4 sm:$0xff]   ;;  %v3932_v53 = vld [vmem:[#allocation5 + $0x188] ss:$16 sps:$4 sm:$0xff]   ;;  %v3933_v54 = vld [vmem:[#allocation5 + $0x1a4] ss:$16 sps:$4 sm:$0xff]  }
  0x99   : > { %1566 = vmatprep.subr.bf16.mxu0 %v3885_v20  ;;  %1730 = vmatprep.subr.bf16.mxu1 %v3887_v21  ;;  %v3935_v55 = vld [vmem:[#allocation5 + $0x1ac] ss:$16 sps:$4 sm:$0xff]   ;;  %v3937_v56 = vld [vmem:[#allocation5 + $0x1a0] ss:$16 sps:$4 sm:$0xff]   ;;  %v3938_v57 = vld [vmem:[#allocation5 + $0x1a8] ss:$16 sps:$4 sm:$0xff]  }
  0x9a   : > { %1588 = vmatprep.mubr.bf16.mxu0 %v348_v48  ;;  %1752 = vmatprep.mubr.bf16.mxu1 %v348_v48  ;;  %v3939_v58 = vld [vmem:[#allocation5 + $0x1c4] ss:$16 sps:$4 sm:$0xff]   ;;  %v3941_v59 = vld [vmem:[#allocation5 + $0x1cc] ss:$16 sps:$4 sm:$0xff]   ;;  %v3943_v60 = vld [vmem:[#allocation5 + $0x1c0] ss:$16 sps:$4 sm:$0xff]  }
  0x9b   : > { %v3944_v61 = vld [vmem:[#allocation5 + $0x1c8] ss:$16 sps:$4 sm:$0xff]   ;;  %v3945_v62 = vld [vmem:[#allocation5 + $0x1e4] ss:$16 sps:$4 sm:$0xff]   ;;  %v3947_v63 = vld [vmem:[#allocation5 + $0x1ec] ss:$16 sps:$4 sm:$0xff]  }
  0x9c   : > { %1567 = vmatpush1.bf16.msra.mxu0 %v3889_v22  ;;  %1731 = vmatpush1.bf16.msra.mxu1 %v3890_v23  ;;  %v3949_v0 = vld [vmem:[#allocation5 + $0x1e0] ss:$16 sps:$4 sm:$0xff]   ;;  %v3950_v1 = vld [vmem:[#allocation5 + $0x1e8] ss:$16 sps:$4 sm:$0xff]   ;;  %v3953_v3 = vld [vmem:[#allocation5 + $0x204] ss:$16 sps:$4 sm:$0xff]  }
  0x9d   : > { %1568 = vmatprep.subr.bf16.mxu0 %v3891_v24  ;;  %1732 = vmatprep.subr.bf16.mxu1 %v3893_v25  ;;  %v3956_v4 = vld [vmem:[#allocation5 + $0x20c] ss:$16 sps:$4 sm:$0xff]   ;;  %v3951_v6 = vld [vmem:[#allocation5 + $0x200] ss:$16 sps:$4 sm:$0xff]   ;;  %v3954_v7 = vld [vmem:[#allocation5 + $0x208] ss:$16 sps:$4 sm:$0xff]  }
  0x9e   : > { %v3959_v8 = vld [vmem:[#allocation5 + $0x224] ss:$16 sps:$4 sm:$0xff]   ;;  %v3962_v9 = vld [vmem:[#allocation5 + $0x22c] ss:$16 sps:$4 sm:$0xff]   ;;  %v3957_v10 = vld [vmem:[#allocation5 + $0x220] ss:$16 sps:$4 sm:$0xff]  }
  0x9f   : > { %v3960_v11 = vld [vmem:[#allocation5 + $0x228] ss:$16 sps:$4 sm:$0xff]   ;;  %v3965_v12 = vld [vmem:[#allocation5 + $0x244] ss:$16 sps:$4 sm:$0xff]   ;;  %v3968_v13 = vld [vmem:[#allocation5 + $0x24c] ss:$16 sps:$4 sm:$0xff]  }
  0xa0   : > { %1569 = vmatpush1.bf16.msra.mxu0 %v3895_v26  ;;  %1733 = vmatpush1.bf16.msra.mxu1 %v3896_v27  ;;  %v3963_v14 = vld [vmem:[#allocation5 + $0x240] ss:$16 sps:$4 sm:$0xff]   ;;  %v3966_v15 = vld [vmem:[#allocation5 + $0x248] ss:$16 sps:$4 sm:$0xff]   ;;  %v3971_v16 = vld [vmem:[#allocation5 + $0x264] ss:$16 sps:$4 sm:$0xff]  }
  0xa1   : > { %1570 = vmatprep.subr.bf16.mxu0 %v3897_v28  ;;  %1734 = vmatprep.subr.bf16.mxu1 %v3899_v29  ;;  %v3974_v17 = vld [vmem:[#allocation5 + $0x26c] ss:$16 sps:$4 sm:$0xff]   ;;  %v3969_v18 = vld [vmem:[#allocation5 + $0x260] ss:$16 sps:$4 sm:$0xff]   ;;  %v3972_v19 = vld [vmem:[#allocation5 + $0x268] ss:$16 sps:$4 sm:$0xff]  }
  0xa2   : > { %v3977_v20 = vld [vmem:[#allocation5 + $0x284] ss:$16 sps:$4 sm:$0xff]   ;;  %v3980_v21 = vld [vmem:[#allocation5 + $0x28c] ss:$16 sps:$4 sm:$0xff]   ;;  %v3975_v22 = vld [vmem:[#allocation5 + $0x280] ss:$16 sps:$4 sm:$0xff]  }
  0xa3   : > { %v3978_v23 = vld [vmem:[#allocation5 + $0x288] ss:$16 sps:$4 sm:$0xff]   ;;  %v3983_v24 = vld [vmem:[#allocation5 + $0x2a4] ss:$16 sps:$4 sm:$0xff]   ;;  %v3986_v25 = vld [vmem:[#allocation5 + $0x2ac] ss:$16 sps:$4 sm:$0xff]  }
  0xa4   : > { %1571 = vmatpush1.bf16.msra.mxu0 %v3901_v30  ;;  %1735 = vmatpush1.bf16.msra.mxu1 %v3902_v31  ;;  %v3981_v26 = vld [vmem:[#allocation5 + $0x2a0] ss:$16 sps:$4 sm:$0xff]   ;;  %v3984_v27 = vld [vmem:[#allocation5 + $0x2a8] ss:$16 sps:$4 sm:$0xff]   ;;  %v3989_v28 = vld [vmem:[#allocation5 + $0x2c4] ss:$16 sps:$4 sm:$0xff]  }
  0xa5   : > { %1572 = vmatprep.subr.bf16.mxu0 %v3903_v32  ;;  %1736 = vmatprep.subr.bf16.mxu1 %v3905_v33  ;;  %v3992_v29 = vld [vmem:[#allocation5 + $0x2cc] ss:$16 sps:$4 sm:$0xff]   ;;  %v3987_v31 = vld [vmem:[#allocation5 + $0x2c0] ss:$16 sps:$4 sm:$0xff]   ;;  %v3990_v33 = vld [vmem:[#allocation5 + $0x2c8] ss:$16 sps:$4 sm:$0xff]  }
  0xa6   : > { %v343_v30 = vld [vmem:[%s4807_s29 + $0x18] sm:$0xff]  ;;  %s338_s16 = scalar_lea.vmem [#allocation10], %s3322_s22  ;;  %s4572_s28 = smov [#allocation10]  }
  0xa7   : > { %v350_v32 = vpack.c.bf16 %v343_v30, %v343_v30  ;;  %v4013_v46 = vld [vmem:[#allocation5 + $0x344] ss:$16 sps:$4 sm:$0xff]   ;;  %v4011_v48 = vld [vmem:[#allocation5 + $0x340] ss:$16 sps:$4 sm:$0xff]   ;;  %s3212_s14 = sshll.u32 %s338_s16, 4  ;;  %s4491_s9 = sshll.u32 %s4572_s28, 4  ;;  %s4875_s14 = int_to_ptr.vmem [resolvable:$true] %s3212_s14  ;;  %s4492_s9 = int_to_ptr.vmem [resolvable:$false] %s4491_s9 }
  0xa8   : > { %1573 = vmatpush1.bf16.msra.mxu0 %v3907_v34  ;;  %1737 = vmatpush1.bf16.msra.mxu1 %v3908_v35  ;;  %v3995_v34 = vld [vmem:[#allocation5 + $0x2e4] ss:$16 sps:$4 sm:$0xff]   ;;  %v3998_v35 = vld [vmem:[#allocation5 + $0x2ec] ss:$16 sps:$4 sm:$0xff]   ;;  %s4487_s30 = scalar_lea.vmem %s4875_s14, 128  ;;  %s4493_s23 = scalar_lea.vmem %s4492_s9, 256 }
  0xa9   : > { %1574 = vmatprep.subr.bf16.mxu0 %v3909_v36  ;;  %1738 = vmatprep.subr.bf16.mxu1 %v3911_v37  ;;  %v3993_v36 = vld [vmem:[#allocation5 + $0x2e0] ss:$16 sps:$4 sm:$0xff]   ;;  %v3996_v37 = vld [vmem:[#allocation5 + $0x2e8] ss:$16 sps:$4 sm:$0xff]   ;;  %v4043_v2 = vld [vmem:[#allocation5 + $0x3e4] ss:$16 sps:$4 sm:$0xff]   ;;  %p4488_p10 = scmp.ne.s32.totalorder %s4875_s14, %s4487_s30  ;;  %p4494_p12 = scmp.lt.s32.totalorder %s4875_s14, %s4492_s9 }
  0xaa   : > { %v4079_v30 = vld [vmem:[#allocation5 + $0x4a4] ss:$16 sps:$4 sm:$0xff]   ;;  %p4495_p2 = scmp.lt.s32.totalorder %s4493_s23, %s4487_s30 }
  0xab   : > { %p4489_p3 = pnand %p4488_p10, %p4758_p5 }
  0xac   : > { %1575 = vmatpush1.bf16.msra.mxu0 %v3913_v38  ;;  %1739 = vmatpush1.bf16.msra.mxu1 %v3914_v39  ;;  %v4001_v38 = vld [vmem:[#allocation5 + $0x304] ss:$16 sps:$4 sm:$0xff]   ;;  %v4004_v39 = vld [vmem:[#allocation5 + $0x30c] ss:$16 sps:$4 sm:$0xff]   ;;  %p4496_p1 = por %p4495_p2, %p4494_p12 }
  0xad   : > { %1576 = vmatprep.subr.bf16.mxu0 %v3915_v40  ;;  %1740 = vmatprep.subr.bf16.mxu1 %v3917_v41  ;;  %v3999_v40 = vld [vmem:[#allocation5 + $0x300] ss:$16 sps:$4 sm:$0xff]   ;;  %v4002_v41 = vld [vmem:[#allocation5 + $0x308] ss:$16 sps:$4 sm:$0xff]   ;;  %p4490_p7 = pneg %p4489_p3 }
  0xaf   : > { %p4497_p4 = pnand %p4496_p1, %p4490_p7 }
  0xb0   : > { %1577 = vmatpush1.bf16.msra.mxu0 %v3919_v42  ;;  %1741 = vmatpush1.bf16.msra.mxu1 %v3920_v43  ;;  %v4007_v42 = vld [vmem:[#allocation5 + $0x324] ss:$16 sps:$4 sm:$0xff]   ;;  %v4010_v43 = vld [vmem:[#allocation5 + $0x32c] ss:$16 sps:$4 sm:$0xff]  }
  0xb1   : > { %1578 = vmatprep.subr.bf16.mxu0 %v3921_v44  ;;  %1742 = vmatprep.subr.bf16.mxu1 %v3923_v45  ;;  %v4005_v44 = vld [vmem:[#allocation5 + $0x320] ss:$16 sps:$4 sm:$0xff]   ;;  %v4008_v45 = vld [vmem:[#allocation5 + $0x328] ss:$16 sps:$4 sm:$0xff]  }
  0xb4   : > { %1579 = vmatpush1.bf16.msra.mxu0 %v3925_v47  ;;  %1743 = vmatpush1.bf16.msra.mxu1 %v3926_v49  ;;  %v4016_v47 = vld [vmem:[#allocation5 + $0x34c] ss:$16 sps:$4 sm:$0xff]   ;;  %v4014_v49 = vld [vmem:[#allocation5 + $0x348] ss:$16 sps:$4 sm:$0xff]  }
  0xb5   : > { %1580 = vmatprep.subr.bf16.mxu0 %v3927_v50  ;;  %1744 = vmatprep.subr.bf16.mxu1 %v3929_v51  ;;  %v4019_v50 = vld [vmem:[#allocation5 + $0x364] ss:$16 sps:$4 sm:$0xff]   ;;  %v4022_v51 = vld [vmem:[#allocation5 + $0x36c] ss:$16 sps:$4 sm:$0xff]  }
  0xb8   : > { %1581 = vmatpush1.bf16.msra.mxu0 %v3931_v52  ;;  %1745 = vmatpush1.bf16.msra.mxu1 %v3932_v53  ;;  %v4017_v52 = vld [vmem:[#allocation5 + $0x360] ss:$16 sps:$4 sm:$0xff]   ;;  %v4020_v53 = vld [vmem:[#allocation5 + $0x368] ss:$16 sps:$4 sm:$0xff]  }
  0xb9   : > { %1582 = vmatprep.subr.bf16.mxu0 %v3933_v54  ;;  %1746 = vmatprep.subr.bf16.mxu1 %v3935_v55  ;;  %v4025_v54 = vld [vmem:[#allocation5 + $0x384] ss:$16 sps:$4 sm:$0xff]   ;;  %v4028_v55 = vld [vmem:[#allocation5 + $0x38c] ss:$16 sps:$4 sm:$0xff]  }
  0xbc   : > { %1583 = vmatpush1.bf16.msra.mxu0 %v3937_v56  ;;  %1747 = vmatpush1.bf16.msra.mxu1 %v3938_v57  ;;  %v4023_v56 = vld [vmem:[#allocation5 + $0x380] ss:$16 sps:$4 sm:$0xff]   ;;  %v4026_v57 = vld [vmem:[#allocation5 + $0x388] ss:$16 sps:$4 sm:$0xff]  }
  0xbd   : > { %1584 = vmatprep.subr.bf16.mxu0 %v3939_v58  ;;  %1748 = vmatprep.subr.bf16.mxu1 %v3941_v59  ;;  %v4031_v58 = vld [vmem:[#allocation5 + $0x3a4] ss:$16 sps:$4 sm:$0xff]   ;;  %v4034_v59 = vld [vmem:[#allocation5 + $0x3ac] ss:$16 sps:$4 sm:$0xff]  }
  0xc0   : > { %1585 = vmatpush1.bf16.msra.mxu0 %v3943_v60  ;;  %1749 = vmatpush1.bf16.msra.mxu1 %v3944_v61  ;;  %v4029_v60 = vld [vmem:[#allocation5 + $0x3a0] ss:$16 sps:$4 sm:$0xff]   ;;  %v4032_v61 = vld [vmem:[#allocation5 + $0x3a8] ss:$16 sps:$4 sm:$0xff]  }
  0xc1   : > { %1586 = vmatprep.subr.bf16.mxu0 %v3945_v62  ;;  %1750 = vmatprep.subr.bf16.mxu1 %v3947_v63  ;;  %v4037_v62 = vld [vmem:[#allocation5 + $0x3c4] ss:$16 sps:$4 sm:$0xff]   ;;  %v4040_v63 = vld [vmem:[#allocation5 + $0x3cc] ss:$16 sps:$4 sm:$0xff]  }
  0xc4   : > { %1587 = vmatpush1.bf16.msra.mxu0 %v3949_v0  ;;  %1751 = vmatpush1.bf16.msra.mxu1 %v3950_v1  ;;  %v4035_v0 = vld [vmem:[#allocation5 + $0x3c0] ss:$16 sps:$4 sm:$0xff]   ;;  %v4038_v1 = vld [vmem:[#allocation5 + $0x3c8] ss:$16 sps:$4 sm:$0xff]  }
  0xc5   : > { %1597 = vmatprep.subr.bf16.mxu0 %v3953_v3  ;;  %1761 = vmatprep.subr.bf16.mxu1 %v3956_v4  ;;  %v4046_v3 = vld [vmem:[#allocation5 + $0x3ec] ss:$16 sps:$4 sm:$0xff]   ;;  %v4041_v4 = vld [vmem:[#allocation5 + $0x3e0] ss:$16 sps:$4 sm:$0xff]  }
  0xc7   : > { %1589 = vmatmul.mubr.bf16.vlgmr.msra.gmra.mrb[0].mxu0 %v347_v5  ;;  %1753 = vmatmul.mubr.bf16.vlgmr.msra.gmra.mrb[0].mxu1 %v347_v5  ;;  %v4044_v5 = vld [vmem:[#allocation5 + $0x3e8] ss:$16 sps:$4 sm:$0xff]  }
  0xc8   : > { %1598 = vmatpush1.bf16.msra.mxu0 %v3951_v6  ;;  %1762 = vmatpush1.bf16.msra.mxu1 %v3954_v7  ;;  %v4049_v6 = vld [vmem:[#allocation5 + $0x404] ss:$16 sps:$4 sm:$0xff]  }
  0xc9   : > { %1599 = vmatprep.subr.bf16.mxu0 %v3959_v8  ;;  %1763 = vmatprep.subr.bf16.mxu1 %v3962_v9  ;;  %v342_v7 = vld [vmem:[%s4807_s29 + $0x10] sm:$0xff] }
  0xca   : > { %1629 = vmatprep.mubr.bf16.mxu0 %v350_v32  ;;  %1793 = vmatprep.mubr.bf16.mxu1 %v350_v32  ;;  %v4052_v8 = vld [vmem:[#allocation5 + $0x40c] ss:$16 sps:$4 sm:$0xff]   ;;  %v4047_v9 = vld [vmem:[#allocation5 + $0x400] ss:$16 sps:$4 sm:$0xff]  }
  0xcb   : > { %v4077_v32 = vld [vmem:[#allocation5 + $0x4a0] ss:$16 sps:$4 sm:$0xff]  }
  0xcc   : > { %1600 = vmatpush1.bf16.msra.mxu0 %v3957_v10  ;;  %1764 = vmatpush1.bf16.msra.mxu1 %v3960_v11  ;;  %v349_v10 = vpack.c.bf16 %v342_v7, %v342_v7  ;;  %v4050_v11 = vld [vmem:[#allocation5 + $0x408] ss:$16 sps:$4 sm:$0xff]   ;;  %v4142_v7 = vld [vmem:[#allocation5 + $0x5ec] ss:$16 sps:$4 sm:$0xff]  }
  0xcd   : > { %1601 = vmatprep.subr.bf16.mxu0 %v3965_v12  ;;  %1765 = vmatprep.subr.bf16.mxu1 %v3968_v13  ;;  %v4055_v12 = vld [vmem:[#allocation5 + $0x424] ss:$16 sps:$4 sm:$0xff]   ;;  %v4058_v13 = vld [vmem:[#allocation5 + $0x42c] ss:$16 sps:$4 sm:$0xff]  }
  0xd0   : > { %1602 = vmatpush1.bf16.msra.mxu0 %v3963_v14  ;;  %1766 = vmatpush1.bf16.msra.mxu1 %v3966_v15  ;;  %v345_v14 = vld [vmem:[%s4807_s29 + $0x28] sm:$0xff] }
  0xd1   : > { %1603 = vmatprep.subr.bf16.mxu0 %v3971_v16  ;;  %1767 = vmatprep.subr.bf16.mxu1 %v3974_v17  ;;  %v352_v15 = vpack.c.bf16 %v345_v14, %v345_v14  ;;  %v4053_v16 = vld [vmem:[#allocation5 + $0x420] ss:$16 sps:$4 sm:$0xff]   ;;  %v4056_v17 = vld [vmem:[#allocation5 + $0x428] ss:$16 sps:$4 sm:$0xff]  }
  0xd2   : > { %v4146_v14 = vld [vmem:[#allocation5 + $0x608] ss:$16 sps:$4 sm:$0xff]  }
  0xd4   : > { %1604 = vmatpush1.bf16.msra.mxu0 %v3969_v18  ;;  %1768 = vmatpush1.bf16.msra.mxu1 %v3972_v19  ;;  %v4061_v18 = vld [vmem:[#allocation5 + $0x444] ss:$16 sps:$4 sm:$0xff]   ;;  %v4064_v19 = vld [vmem:[#allocation5 + $0x44c] ss:$16 sps:$4 sm:$0xff]  }
  0xd5   : > { %1605 = vmatprep.subr.bf16.mxu0 %v3977_v20  ;;  %1769 = vmatprep.subr.bf16.mxu1 %v3980_v21  ;;  %v4059_v20 = vld [vmem:[#allocation5 + $0x440] ss:$16 sps:$4 sm:$0xff]   ;;  %v4062_v21 = vld [vmem:[#allocation5 + $0x448] ss:$16 sps:$4 sm:$0xff]  }
  0xd8   : > { %1606 = vmatpush1.bf16.msra.mxu0 %v3975_v22  ;;  %1770 = vmatpush1.bf16.msra.mxu1 %v3978_v23  ;;  %v4067_v22 = vld [vmem:[#allocation5 + $0x464] ss:$16 sps:$4 sm:$0xff]   ;;  %v4070_v23 = vld [vmem:[#allocation5 + $0x46c] ss:$16 sps:$4 sm:$0xff]  }
  0xd9   : > { %1607 = vmatprep.subr.bf16.mxu0 %v3983_v24  ;;  %1771 = vmatprep.subr.bf16.mxu1 %v3986_v25  ;;  %v4065_v24 = vld [vmem:[#allocation5 + $0x460] ss:$16 sps:$4 sm:$0xff]   ;;  %v4068_v25 = vld [vmem:[#allocation5 + $0x468] ss:$16 sps:$4 sm:$0xff]  }
  0xdc   : > { %1608 = vmatpush1.bf16.msra.mxu0 %v3981_v26  ;;  %1772 = vmatpush1.bf16.msra.mxu1 %v3984_v27  ;;  %v4073_v26 = vld [vmem:[#allocation5 + $0x484] ss:$16 sps:$4 sm:$0xff]   ;;  %v4076_v27 = vld [vmem:[#allocation5 + $0x48c] ss:$16 sps:$4 sm:$0xff]  }
  0xdd   : > { %1609 = vmatprep.subr.bf16.mxu0 %v3989_v28  ;;  %1773 = vmatprep.subr.bf16.mxu1 %v3992_v29  ;;  %v4071_v28 = vld [vmem:[#allocation5 + $0x480] ss:$16 sps:$4 sm:$0xff]   ;;  %v4074_v29 = vld [vmem:[#allocation5 + $0x488] ss:$16 sps:$4 sm:$0xff]  }
  0xe0   : > { %1610 = vmatpush1.bf16.msra.mxu0 %v3987_v31  ;;  %1774 = vmatpush1.bf16.msra.mxu1 %v3990_v33  ;;  %v4082_v31 = vld [vmem:[#allocation5 + $0x4ac] ss:$16 sps:$4 sm:$0xff]   ;;  %v4080_v33 = vld [vmem:[#allocation5 + $0x4a8] ss:$16 sps:$4 sm:$0xff]  }
  0xe1   : > { %1611 = vmatprep.subr.bf16.mxu0 %v3995_v34  ;;  %1775 = vmatprep.subr.bf16.mxu1 %v3998_v35  ;;  %v4085_v34 = vld [vmem:[#allocation5 + $0x4c4] ss:$16 sps:$4 sm:$0xff]   ;;  %v4088_v35 = vld [vmem:[#allocation5 + $0x4cc] ss:$16 sps:$4 sm:$0xff]  }
  0xe4   : > { %1612 = vmatpush1.bf16.msra.mxu0 %v3993_v36  ;;  %1776 = vmatpush1.bf16.msra.mxu1 %v3996_v37  ;;  %v4083_v36 = vld [vmem:[#allocation5 + $0x4c0] ss:$16 sps:$4 sm:$0xff]   ;;  %v4086_v37 = vld [vmem:[#allocation5 + $0x4c8] ss:$16 sps:$4 sm:$0xff]  }
  0xe5   : > { %1613 = vmatprep.subr.bf16.mxu0 %v4001_v38  ;;  %1777 = vmatprep.subr.bf16.mxu1 %v4004_v39  ;;  %v4091_v38 = vld [vmem:[#allocation5 + $0x4e4] ss:$16 sps:$4 sm:$0xff]   ;;  %v4094_v39 = vld [vmem:[#allocation5 + $0x4ec] ss:$16 sps:$4 sm:$0xff]  }
  0xe8   : > { %1614 = vmatpush1.bf16.msra.mxu0 %v3999_v40  ;;  %1778 = vmatpush1.bf16.msra.mxu1 %v4002_v41  ;;  %v4089_v40 = vld [vmem:[#allocation5 + $0x4e0] ss:$16 sps:$4 sm:$0xff]   ;;  %v4092_v41 = vld [vmem:[#allocation5 + $0x4e8] ss:$16 sps:$4 sm:$0xff]  }
  0xe9   : > { %1615 = vmatprep.subr.bf16.mxu0 %v4007_v42  ;;  %1779 = vmatprep.subr.bf16.mxu1 %v4010_v43  ;;  %v4097_v42 = vld [vmem:[#allocation5 + $0x504] ss:$16 sps:$4 sm:$0xff]   ;;  %v4100_v43 = vld [vmem:[#allocation5 + $0x50c] ss:$16 sps:$4 sm:$0xff]  }
  0xec   : > { %1616 = vmatpush1.bf16.msra.mxu0 %v4005_v44  ;;  %1780 = vmatpush1.bf16.msra.mxu1 %v4008_v45  ;;  %v4095_v44 = vld [vmem:[#allocation5 + $0x500] ss:$16 sps:$4 sm:$0xff]   ;;  %v4098_v45 = vld [vmem:[#allocation5 + $0x508] ss:$16 sps:$4 sm:$0xff]  }
  0xed   : > { %1617 = vmatprep.subr.bf16.mxu0 %v4013_v46  ;;  %1781 = vmatprep.subr.bf16.mxu1 %v4016_v47  ;;  %v4103_v46 = vld [vmem:[#allocation5 + $0x524] ss:$16 sps:$4 sm:$0xff]   ;;  %v4106_v47 = vld [vmem:[#allocation5 + $0x52c] ss:$16 sps:$4 sm:$0xff]  }
  0xf0   : > { %1618 = vmatpush1.bf16.msra.mxu0 %v4011_v48  ;;  %1782 = vmatpush1.bf16.msra.mxu1 %v4014_v49  ;;  %v4101_v48 = vld [vmem:[#allocation5 + $0x520] ss:$16 sps:$4 sm:$0xff]   ;;  %v4104_v49 = vld [vmem:[#allocation5 + $0x528] ss:$16 sps:$4 sm:$0xff]  }
  0xf1   : > { %1619 = vmatprep.subr.bf16.mxu0 %v4019_v50  ;;  %1783 = vmatprep.subr.bf16.mxu1 %v4022_v51  ;;  %v4109_v50 = vld [vmem:[#allocation5 + $0x544] ss:$16 sps:$4 sm:$0xff]   ;;  %v4112_v51 = vld [vmem:[#allocation5 + $0x54c] ss:$16 sps:$4 sm:$0xff]  }
  0xf4   : > { %1620 = vmatpush1.bf16.msra.mxu0 %v4017_v52  ;;  %1784 = vmatpush1.bf16.msra.mxu1 %v4020_v53  ;;  %v4107_v52 = vld [vmem:[#allocation5 + $0x540] ss:$16 sps:$4 sm:$0xff]   ;;  %v4110_v53 = vld [vmem:[#allocation5 + $0x548] ss:$16 sps:$4 sm:$0xff]  }
  0xf5   : > { %1621 = vmatprep.subr.bf16.mxu0 %v4025_v54  ;;  %1785 = vmatprep.subr.bf16.mxu1 %v4028_v55  ;;  %v4115_v54 = vld [vmem:[#allocation5 + $0x564] ss:$16 sps:$4 sm:$0xff]   ;;  %v4118_v55 = vld [vmem:[#allocation5 + $0x56c] ss:$16 sps:$4 sm:$0xff]  }
  0xf8   : > { %1622 = vmatpush1.bf16.msra.mxu0 %v4023_v56  ;;  %1786 = vmatpush1.bf16.msra.mxu1 %v4026_v57  ;;  %v4113_v56 = vld [vmem:[#allocation5 + $0x560] ss:$16 sps:$4 sm:$0xff]   ;;  %v4116_v57 = vld [vmem:[#allocation5 + $0x568] ss:$16 sps:$4 sm:$0xff]  }
  0xf9   : > { %1623 = vmatprep.subr.bf16.mxu0 %v4031_v58  ;;  %1787 = vmatprep.subr.bf16.mxu1 %v4034_v59  ;;  %v4121_v58 = vld [vmem:[#allocation5 + $0x584] ss:$16 sps:$4 sm:$0xff]   ;;  %v4124_v59 = vld [vmem:[#allocation5 + $0x58c] ss:$16 sps:$4 sm:$0xff]  }
  0xfc   : > { %1624 = vmatpush1.bf16.msra.mxu0 %v4029_v60  ;;  %1788 = vmatpush1.bf16.msra.mxu1 %v4032_v61  ;;  %v4119_v60 = vld [vmem:[#allocation5 + $0x580] ss:$16 sps:$4 sm:$0xff]   ;;  %v4122_v61 = vld [vmem:[#allocation5 + $0x588] ss:$16 sps:$4 sm:$0xff]  }
  0xfd   : > { %1625 = vmatprep.subr.bf16.mxu0 %v4037_v62  ;;  %1789 = vmatprep.subr.bf16.mxu1 %v4040_v63  ;;  %v4127_v62 = vld [vmem:[#allocation5 + $0x5a4] ss:$16 sps:$4 sm:$0xff]   ;;  %v4130_v63 = vld [vmem:[#allocation5 + $0x5ac] ss:$16 sps:$4 sm:$0xff]  }
 0x100   : > { %1626 = vmatpush1.bf16.msra.mxu0 %v4035_v0  ;;  %1790 = vmatpush1.bf16.msra.mxu1 %v4038_v1  ;;  %v4125_v0 = vld [vmem:[#allocation5 + $0x5a0] ss:$16 sps:$4 sm:$0xff]   ;;  %v4128_v1 = vld [vmem:[#allocation5 + $0x5a8] ss:$16 sps:$4 sm:$0xff]  }
 0x101   : > { %1627 = vmatprep.subr.bf16.mxu0 %v4043_v2  ;;  %1791 = vmatprep.subr.bf16.mxu1 %v4046_v3  ;;  %v4133_v2 = vld [vmem:[#allocation5 + $0x5c4] ss:$16 sps:$4 sm:$0xff]   ;;  %v4136_v3 = vld [vmem:[#allocation5 + $0x5cc] ss:$16 sps:$4 sm:$0xff]  }
 0x104   : > { %1628 = vmatpush1.bf16.msra.mxu0 %v4041_v4  ;;  %1792 = vmatpush1.bf16.msra.mxu1 %v4044_v5  ;;  %v4131_v4 = vld [vmem:[#allocation5 + $0x5c0] ss:$16 sps:$4 sm:$0xff]   ;;  %v4134_v5 = vld [vmem:[#allocation5 + $0x5c8] ss:$16 sps:$4 sm:$0xff]  }
 0x105   : > { %1638 = vmatprep.subr.bf16.mxu0 %v4049_v6  ;;  %1802 = vmatprep.subr.bf16.mxu1 %v4052_v8  ;;  %v4139_v6 = vld [vmem:[#allocation5 + $0x5e4] ss:$16 sps:$4 sm:$0xff]   ;;  %v4137_v8 = vld [vmem:[#allocation5 + $0x5e0] ss:$16 sps:$4 sm:$0xff]  }
 0x107   : > { %1630 = vmatmul.mubr.bf16.vlgmr.msra.gmra.mrb[0].mxu0 %v349_v10  ;;  %1794 = vmatmul.mubr.bf16.vlgmr.msra.gmra.mrb[0].mxu1 %v349_v10  ;;  %v344_v10 = vld [vmem:[%s4807_s29 + $0x20] sm:$0xff] }
 0x108   : > { %1639 = vmatpush1.bf16.msra.mxu0 %v4047_v9  ;;  %1803 = vmatpush1.bf16.msra.mxu1 %v4050_v11  ;;  %v4140_v9 = vld [vmem:[#allocation5 + $0x5e8] ss:$16 sps:$4 sm:$0xff]   ;;  %v4145_v11 = vld [vmem:[#allocation5 + $0x604] ss:$16 sps:$4 sm:$0xff]  }
 0x109   : > { %1640 = vmatprep.subr.bf16.mxu0 %v4055_v12  ;;  %1804 = vmatprep.subr.bf16.mxu1 %v4058_v13  ;;  %v4148_v12 = vld [vmem:[#allocation5 + $0x60c] ss:$16 sps:$4 sm:$0xff]   ;;  %v4143_v13 = vld [vmem:[#allocation5 + $0x600] ss:$16 sps:$4 sm:$0xff]  }
 0x10a   : > { %1670 = vmatprep.mubr.bf16.mxu0 %v352_v15  ;;  %1834 = vmatprep.mubr.bf16.mxu1 %v352_v15  ;;  %v351_v15 = vpack.c.bf16 %v344_v10, %v344_v10  ;;  %v4230_v10 = vld [vmem:[#allocation7 + $0x1a8] ss:$16 sps:$4 sm:$0xff]  }
 0x10c   : > { %1641 = vmatpush1.bf16.msra.mxu0 %v4053_v16  ;;  %1805 = vmatpush1.bf16.msra.mxu1 %v4056_v17  ;;  %v4151_v16 = vld [vmem:[#allocation7 + $0x4] ss:$16 sps:$4 sm:$0xff]   ;;  %v4154_v17 = vld [vmem:[#allocation7 + $0xc] ss:$16 sps:$4 sm:$0xff]  }
 0x10d   : > { %1642 = vmatprep.subr.bf16.mxu0 %v4061_v18  ;;  %1806 = vmatprep.subr.bf16.mxu1 %v4064_v19  ;;  %v4571_v18 = vmov 0   ;;  %v346_v19 = vld [vmem:[%s4807_s29 + $0x30] sm:$0xff]  ;;  %s3199_s29 = scalar_lea.sflag [#allocation4], %s4803_s15 }
 0x110   : > { %1643 = vmatpush1.bf16.msra.mxu0 %v4059_v20  ;;  %1807 = vmatpush1.bf16.msra.mxu1 %v4062_v21  ;;  %v4149_v20 = vld [vmem:[#allocation7] ss:$16 sps:$4 sm:$0xff]   ;;  %v4152_v21 = vld [vmem:[#allocation7 + $0x8] ss:$16 sps:$4 sm:$0xff]  }
 0x111   : > { %1644 = vmatprep.subr.bf16.mxu0 %v4067_v22  ;;  %1808 = vmatprep.subr.bf16.mxu1 %v4070_v23  ;;  %v353_v22 = vpack.c.bf16 %v346_v19, %v346_v19  ;;  %v4157_v23 = vld [vmem:[#allocation7 + $0x24] ss:$16 sps:$4 sm:$0xff]  }
 0x112   : > { %v4247_v19 = vld [vmem:[#allocation7 + $0x204] ss:$16 sps:$4 sm:$0xff]  }
 0x114   : > { %1645 = vmatpush1.bf16.msra.mxu0 %v4065_v24  ;;  %1809 = vmatpush1.bf16.msra.mxu1 %v4068_v25  ;;  %v4160_v24 = vld [vmem:[#allocation7 + $0x2c] ss:$16 sps:$4 sm:$0xff]   ;;  %v4155_v25 = vld [vmem:[#allocation7 + $0x20] ss:$16 sps:$4 sm:$0xff]  }
 0x115   : > { %1646 = vmatprep.subr.bf16.mxu0 %v4073_v26  ;;  %1810 = vmatprep.subr.bf16.mxu1 %v4076_v27  ;;  %v4158_v26 = vld [vmem:[#allocation7 + $0x28] ss:$16 sps:$4 sm:$0xff]   ;;  %v4163_v27 = vld [vmem:[#allocation7 + $0x44] ss:$16 sps:$4 sm:$0xff]  }
 0x118   : > { %1647 = vmatpush1.bf16.msra.mxu0 %v4071_v28  ;;  %1811 = vmatpush1.bf16.msra.mxu1 %v4074_v29  ;;  %v4166_v28 = vld [vmem:[#allocation7 + $0x4c] ss:$16 sps:$4 sm:$0xff]   ;;  %v4161_v29 = vld [vmem:[#allocation7 + $0x40] ss:$16 sps:$4 sm:$0xff]  }
 0x119   : > { %1648 = vmatprep.subr.bf16.mxu0 %v4079_v30  ;;  %1812 = vmatprep.subr.bf16.mxu1 %v4082_v31  ;;  %v4164_v30 = vld [vmem:[#allocation7 + $0x48] ss:$16 sps:$4 sm:$0xff]   ;;  %v4169_v31 = vld [vmem:[#allocation7 + $0x64] ss:$16 sps:$4 sm:$0xff]  }
 0x11c   : > { %1649 = vmatpush1.bf16.msra.mxu0 %v4077_v32  ;;  %1813 = vmatpush1.bf16.msra.mxu1 %v4080_v33  ;;  %v4172_v32 = vld [vmem:[#allocation7 + $0x6c] ss:$16 sps:$4 sm:$0xff]   ;;  %v4167_v33 = vld [vmem:[#allocation7 + $0x60] ss:$16 sps:$4 sm:$0xff]  }
 0x11d   : > { %1650 = vmatprep.subr.bf16.mxu0 %v4085_v34  ;;  %1814 = vmatprep.subr.bf16.mxu1 %v4088_v35  ;;  %v4170_v34 = vld [vmem:[#allocation7 + $0x68] ss:$16 sps:$4 sm:$0xff]   ;;  %v4175_v35 = vld [vmem:[#allocation7 + $0x84] ss:$16 sps:$4 sm:$0xff]  }
 0x120   : > { %1651 = vmatpush1.bf16.msra.mxu0 %v4083_v36  ;;  %1815 = vmatpush1.bf16.msra.mxu1 %v4086_v37  ;;  %v4178_v36 = vld [vmem:[#allocation7 + $0x8c] ss:$16 sps:$4 sm:$0xff]   ;;  %v4173_v37 = vld [vmem:[#allocation7 + $0x80] ss:$16 sps:$4 sm:$0xff]  }
 0x121   : > { %1652 = vmatprep.subr.bf16.mxu0 %v4091_v38  ;;  %1816 = vmatprep.subr.bf16.mxu1 %v4094_v39  ;;  %v4176_v38 = vld [vmem:[#allocation7 + $0x88] ss:$16 sps:$4 sm:$0xff]   ;;  %v4181_v39 = vld [vmem:[#allocation7 + $0xa4] ss:$16 sps:$4 sm:$0xff]  }
 0x124   : > { %1653 = vmatpush1.bf16.msra.mxu0 %v4089_v40  ;;  %1817 = vmatpush1.bf16.msra.mxu1 %v4092_v41  ;;  %v4184_v40 = vld [vmem:[#allocation7 + $0xac] ss:$16 sps:$4 sm:$0xff]   ;;  %v4179_v41 = vld [vmem:[#allocation7 + $0xa0] ss:$16 sps:$4 sm:$0xff]  }
 0x125   : > { %1654 = vmatprep.subr.bf16.mxu0 %v4097_v42  ;;  %1818 = vmatprep.subr.bf16.mxu1 %v4100_v43  ;;  %v4182_v42 = vld [vmem:[#allocation7 + $0xa8] ss:$16 sps:$4 sm:$0xff]   ;;  %v4187_v43 = vld [vmem:[#allocation7 + $0xc4] ss:$16 sps:$4 sm:$0xff]  }
 0x128   : > { %1655 = vmatpush1.bf16.msra.mxu0 %v4095_v44  ;;  %1819 = vmatpush1.bf16.msra.mxu1 %v4098_v45  ;;  %v4190_v44 = vld [vmem:[#allocation7 + $0xcc] ss:$16 sps:$4 sm:$0xff]   ;;  %v4185_v45 = vld [vmem:[#allocation7 + $0xc0] ss:$16 sps:$4 sm:$0xff]  }
 0x129   : > { %1656 = vmatprep.subr.bf16.mxu0 %v4103_v46  ;;  %1820 = vmatprep.subr.bf16.mxu1 %v4106_v47  ;;  %v4188_v46 = vld [vmem:[#allocation7 + $0xc8] ss:$16 sps:$4 sm:$0xff]   ;;  %v4193_v47 = vld [vmem:[#allocation7 + $0xe4] ss:$16 sps:$4 sm:$0xff]  }
 0x12c   : > { %1657 = vmatpush1.bf16.msra.mxu0 %v4101_v48  ;;  %1821 = vmatpush1.bf16.msra.mxu1 %v4104_v49  ;;  %v4196_v48 = vld [vmem:[#allocation7 + $0xec] ss:$16 sps:$4 sm:$0xff]   ;;  %v4191_v49 = vld [vmem:[#allocation7 + $0xe0] ss:$16 sps:$4 sm:$0xff]  }
 0x12d   : > { %1658 = vmatprep.subr.bf16.mxu0 %v4109_v50  ;;  %1822 = vmatprep.subr.bf16.mxu1 %v4112_v51  ;;  %v4194_v50 = vld [vmem:[#allocation7 + $0xe8] ss:$16 sps:$4 sm:$0xff]   ;;  %v4199_v51 = vld [vmem:[#allocation7 + $0x104] ss:$16 sps:$4 sm:$0xff]  }
 0x130   : > { %1659 = vmatpush1.bf16.msra.mxu0 %v4107_v52  ;;  %1823 = vmatpush1.bf16.msra.mxu1 %v4110_v53  ;;  %v4202_v52 = vld [vmem:[#allocation7 + $0x10c] ss:$16 sps:$4 sm:$0xff]   ;;  %v4197_v53 = vld [vmem:[#allocation7 + $0x100] ss:$16 sps:$4 sm:$0xff]  }
 0x131   : > { %1660 = vmatprep.subr.bf16.mxu0 %v4115_v54  ;;  %1824 = vmatprep.subr.bf16.mxu1 %v4118_v55  ;;  %v4200_v54 = vld [vmem:[#allocation7 + $0x108] ss:$16 sps:$4 sm:$0xff]   ;;  %v4205_v55 = vld [vmem:[#allocation7 + $0x124] ss:$16 sps:$4 sm:$0xff]  }
 0x134   : > { %1661 = vmatpush1.bf16.msra.mxu0 %v4113_v56  ;;  %1825 = vmatpush1.bf16.msra.mxu1 %v4116_v57  ;;  %v4208_v56 = vld [vmem:[#allocation7 + $0x12c] ss:$16 sps:$4 sm:$0xff]   ;;  %v4203_v57 = vld [vmem:[#allocation7 + $0x120] ss:$16 sps:$4 sm:$0xff]  }
 0x135   : > { %1662 = vmatprep.subr.bf16.mxu0 %v4121_v58  ;;  %1826 = vmatprep.subr.bf16.mxu1 %v4124_v59  ;;  %v4206_v58 = vld [vmem:[#allocation7 + $0x128] ss:$16 sps:$4 sm:$0xff]   ;;  %v4211_v59 = vld [vmem:[#allocation7 + $0x144] ss:$16 sps:$4 sm:$0xff]  }
 0x138   : > { %1663 = vmatpush1.bf16.msra.mxu0 %v4119_v60  ;;  %1827 = vmatpush1.bf16.msra.mxu1 %v4122_v61  ;;  %v4214_v60 = vld [vmem:[#allocation7 + $0x14c] ss:$16 sps:$4 sm:$0xff]   ;;  %v4209_v61 = vld [vmem:[#allocation7 + $0x140] ss:$16 sps:$4 sm:$0xff]  }
 0x139   : > { %1664 = vmatprep.subr.bf16.mxu0 %v4127_v62  ;;  %1828 = vmatprep.subr.bf16.mxu1 %v4130_v63  ;;  %v4212_v62 = vld [vmem:[#allocation7 + $0x148] ss:$16 sps:$4 sm:$0xff]   ;;  %v4217_v63 = vld [vmem:[#allocation7 + $0x164] ss:$16 sps:$4 sm:$0xff]  }
 0x13c   : > { %1665 = vmatpush1.bf16.msra.mxu0 %v4125_v0  ;;  %1829 = vmatpush1.bf16.msra.mxu1 %v4128_v1  ;;  %v4220_v0 = vld [vmem:[#allocation7 + $0x16c] ss:$16 sps:$4 sm:$0xff]   ;;  %v4215_v1 = vld [vmem:[#allocation7 + $0x160] ss:$16 sps:$4 sm:$0xff]  }
 0x13d   : > { %1666 = vmatprep.subr.bf16.mxu0 %v4133_v2  ;;  %1830 = vmatprep.subr.bf16.mxu1 %v4136_v3  ;;  %v4218_v2 = vld [vmem:[#allocation7 + $0x168] ss:$16 sps:$4 sm:$0xff]   ;;  %v4223_v3 = vld [vmem:[#allocation7 + $0x184] ss:$16 sps:$4 sm:$0xff]  }
 0x140   : > { %1667 = vmatpush1.bf16.msra.mxu0 %v4131_v4  ;;  %1831 = vmatpush1.bf16.msra.mxu1 %v4134_v5  ;;  %v4226_v4 = vld [vmem:[#allocation7 + $0x18c] ss:$16 sps:$4 sm:$0xff]   ;;  %v4221_v5 = vld [vmem:[#allocation7 + $0x180] ss:$16 sps:$4 sm:$0xff]  }
 0x141   : > { %1668 = vmatprep.subr.bf16.mxu0 %v4139_v6  ;;  %1832 = vmatprep.subr.bf16.mxu1 %v4142_v7  ;;  %v4224_v6 = vld [vmem:[#allocation7 + $0x188] ss:$16 sps:$4 sm:$0xff]   ;;  %v4229_v7 = vld [vmem:[#allocation7 + $0x1a4] ss:$16 sps:$4 sm:$0xff]  }
 0x144   : > { %1669 = vmatpush1.bf16.msra.mxu0 %v4137_v8  ;;  %1833 = vmatpush1.bf16.msra.mxu1 %v4140_v9  ;;  %v4232_v8 = vld [vmem:[#allocation7 + $0x1ac] ss:$16 sps:$4 sm:$0xff]   ;;  %v4227_v9 = vld [vmem:[#allocation7 + $0x1a0] ss:$16 sps:$4 sm:$0xff]  }
 0x145   : > { %1679 = vmatprep.subr.bf16.mxu0 %v4145_v11  ;;  %1843 = vmatprep.subr.bf16.mxu1 %v4148_v12  ;;  %v4235_v11 = vld [vmem:[#allocation7 + $0x1c4] ss:$16 sps:$4 sm:$0xff]   ;;  %v4238_v12 = vld [vmem:[#allocation7 + $0x1cc] ss:$16 sps:$4 sm:$0xff]  }
 0x147   : > { %1671 = vmatmul.mubr.bf16.vlgmr.msra.gmra.mrb[0].mxu0 %v351_v15  ;;  %1835 = vmatmul.mubr.bf16.vlgmr.msra.gmra.mrb[0].mxu1 %v351_v15  ;;  %v4241_v15 = vld [vmem:[#allocation7 + $0x1e4] ss:$16 sps:$4 sm:$0xff]  }
 0x148   : > { %1680 = vmatpush1.bf16.msra.mxu0 %v4143_v13  ;;  %1844 = vmatpush1.bf16.msra.mxu1 %v4146_v14  ;;  %v4233_v13 = vld [vmem:[#allocation7 + $0x1c0] ss:$16 sps:$4 sm:$0xff]   ;;  %v4236_v14 = vld [vmem:[#allocation7 + $0x1c8] ss:$16 sps:$4 sm:$0xff]  }
 0x149   : > { %1711 = vmatprep.mubr.bf16.mxu0 %v4571_v18  ;;  %1875 = vmatprep.mubr.bf16.mxu1 %v4571_v18  ;;  %v4242_v18 = vld [vmem:[#allocation7 + $0x1e8] ss:$16 sps:$4 sm:$0xff]  }
 0x14a   : > { %2682 = vmatprep.subr.bf16.mxu0 %v4151_v16  ;;  %2764 = vmatprep.subr.bf16.mxu1 %v4154_v17  ;;  %v4244_v16 = vld [vmem:[#allocation7 + $0x1ec] ss:$16 sps:$4 sm:$0xff]   ;;  %v4239_v17 = vld [vmem:[#allocation7 + $0x1e0] ss:$16 sps:$4 sm:$0xff]  }
 0x153   : > { %3519 = vmatmul.mubr.msk.bf16.vlgmr.msra.gmra.mrb[0].mxu0 %vm1552_vm0, %v353_v22  ;;  %3520 = vmatmul.mubr.msk.bf16.vlgmr.msra.gmra.mrb[0].mxu1 %vm1552_vm0, %v353_v22 }
 0x154   : > { %2683 = vmatpush1.bf16.msra.mxu0 %v4149_v20  ;;  %2765 = vmatpush1.bf16.msra.mxu1 %v4152_v21  ;;  %v4250_v20 = vld [vmem:[#allocation7 + $0x20c] ss:$16 sps:$4 sm:$0xff]   ;;  %v552_v21 = vlaneseq }
 0x155   : > { %2684 = vmatprep.subr.bf16.mxu0 %v4157_v23  ;;  %2766 = vmatprep.subr.bf16.mxu1 %v4160_v24  ;;  %v4834_v24 = vld [vmem:[%s4919_s2] sm:$0xf] }
 0x156   : > { %v4828_v22 = vshrl.u32 %v552_v21, 7  ;;  %v4307_v21 = vld [vmem:[#allocation7 + $0x344] ss:$16 sps:$4 sm:$0xff]  }
 0x158   : > { %2685 = vmatpush1.bf16.msra.mxu0 %v4155_v25  ;;  %2767 = vmatpush1.bf16.msra.mxu1 %v4158_v26  ;;  %v554_v23 = vsub.s32 0, %v4828_v22  ;;  %v558_v25 = vsub.s32 1, %v4828_v22  ;;  %v566_v26 = vsub.s32 3, %v4828_v22 }
 0x159   : > { %2686 = vmatprep.subr.bf16.mxu0 %v4163_v27  ;;  %2768 = vmatprep.subr.bf16.mxu1 %v4166_v28 }
 0x15a   : > { %v555_v27 = vrot.slane %v4834_v24, %v554_v23  ;;  %v559_v28 = vrot.slane %v4834_v24, %v558_v25 }
 0x15c   : > { %2687 = vmatpush1.bf16.msra.mxu0 %v4161_v29  ;;  %2769 = vmatpush1.bf16.msra.mxu1 %v4164_v30  ;;  %v567_v29 = vrot.slane %v4834_v24, %v566_v26 }
 0x15d   : > { %2688 = vmatprep.subr.bf16.mxu0 %v4169_v31  ;;  %2770 = vmatprep.subr.bf16.mxu1 %v4172_v32 }
 0x160   : > { %2689 = vmatpush1.bf16.msra.mxu0 %v4167_v33  ;;  %2771 = vmatpush1.bf16.msra.mxu1 %v4170_v34 }
 0x161   : > { %2690 = vmatprep.subr.bf16.mxu0 %v4175_v35  ;;  %2772 = vmatprep.subr.bf16.mxu1 %v4178_v36 }
 0x164   : > { %2691 = vmatpush1.bf16.msra.mxu0 %v4173_v37  ;;  %2773 = vmatpush1.bf16.msra.mxu1 %v4176_v38 }
 0x165   : > { %2692 = vmatprep.subr.bf16.mxu0 %v4181_v39  ;;  %2774 = vmatprep.subr.bf16.mxu1 %v4184_v40 }
 0x168   : > { %2693 = vmatpush1.bf16.msra.mxu0 %v4179_v41  ;;  %2775 = vmatpush1.bf16.msra.mxu1 %v4182_v42 }
 0x169   : > { %2694 = vmatprep.subr.bf16.mxu0 %v4187_v43  ;;  %2776 = vmatprep.subr.bf16.mxu1 %v4190_v44 }
 0x16c   : > { %2695 = vmatpush1.bf16.msra.mxu0 %v4185_v45  ;;  %2777 = vmatpush1.bf16.msra.mxu1 %v4188_v46  ;;  %v4245_v45 = vld [vmem:[#allocation7 + $0x200] ss:$16 sps:$4 sm:$0xff]   ;;  %v4248_v46 = vld [vmem:[#allocation7 + $0x208] ss:$16 sps:$4 sm:$0xff]  }
 0x16d   : > { %2696 = vmatprep.subr.bf16.mxu0 %v4193_v47  ;;  %2778 = vmatprep.subr.bf16.mxu1 %v4196_v48  ;;  %v4253_v48 = vld [vmem:[#allocation7 + $0x224] ss:$16 sps:$4 sm:$0xff]  }
 0x170   : > { %2697 = vmatpush1.bf16.msra.mxu0 %v4191_v49  ;;  %2779 = vmatpush1.bf16.msra.mxu1 %v4194_v50  ;;  %v4256_v49 = vld [vmem:[#allocation7 + $0x22c] ss:$16 sps:$4 sm:$0xff]  }
 0x171   : > { %2698 = vmatprep.subr.bf16.mxu0 %v4199_v51  ;;  %2780 = vmatprep.subr.bf16.mxu1 %v4202_v52  ;;  %v4251_v51 = vld [vmem:[#allocation7 + $0x220] ss:$16 sps:$4 sm:$0xff]   ;;  %v4254_v52 = vld [vmem:[#allocation7 + $0x228] ss:$16 sps:$4 sm:$0xff]  }
 0x174   : > { %2699 = vmatpush1.bf16.msra.mxu0 %v4197_v53  ;;  %2781 = vmatpush1.bf16.msra.mxu1 %v4200_v54  ;;  %v4259_v53 = vld [vmem:[#allocation7 + $0x244] ss:$16 sps:$4 sm:$0xff]   ;;  %v4262_v54 = vld [vmem:[#allocation7 + $0x24c] ss:$16 sps:$4 sm:$0xff]  }
 0x175   : > { %2700 = vmatprep.subr.bf16.mxu0 %v4205_v55  ;;  %2782 = vmatprep.subr.bf16.mxu1 %v4208_v56  ;;  %v4257_v55 = vld [vmem:[#allocation7 + $0x240] ss:$16 sps:$4 sm:$0xff]   ;;  %v4260_v56 = vld [vmem:[#allocation7 + $0x248] ss:$16 sps:$4 sm:$0xff]  }
 0x178   : > { %2701 = vmatpush1.bf16.msra.mxu0 %v4203_v57  ;;  %2783 = vmatpush1.bf16.msra.mxu1 %v4206_v58  ;;  %v4265_v57 = vld [vmem:[#allocation7 + $0x264] ss:$16 sps:$4 sm:$0xff]   ;;  %v4268_v58 = vld [vmem:[#allocation7 + $0x26c] ss:$16 sps:$4 sm:$0xff]  }
 0x179   : > { %2702 = vmatprep.subr.bf16.mxu0 %v4211_v59  ;;  %2784 = vmatprep.subr.bf16.mxu1 %v4214_v60  ;;  %v4263_v59 = vld [vmem:[#allocation7 + $0x260] ss:$16 sps:$4 sm:$0xff]   ;;  %v4266_v60 = vld [vmem:[#allocation7 + $0x268] ss:$16 sps:$4 sm:$0xff]  }
 0x17c   : > { %2703 = vmatpush1.bf16.msra.mxu0 %v4209_v61  ;;  %2785 = vmatpush1.bf16.msra.mxu1 %v4212_v62  ;;  %v4271_v61 = vld [vmem:[#allocation7 + $0x284] ss:$16 sps:$4 sm:$0xff]   ;;  %v4274_v62 = vld [vmem:[#allocation7 + $0x28c] ss:$16 sps:$4 sm:$0xff]  }
 0x17d   : > { %2704 = vmatprep.subr.bf16.mxu0 %v4217_v63  ;;  %2786 = vmatprep.subr.bf16.mxu1 %v4220_v0  ;;  %v4269_v63 = vld [vmem:[#allocation7 + $0x280] ss:$16 sps:$4 sm:$0xff]   ;;  %v4272_v0 = vld [vmem:[#allocation7 + $0x288] ss:$16 sps:$4 sm:$0xff]  }
 0x180   : > { %2705 = vmatpush1.bf16.msra.mxu0 %v4215_v1  ;;  %2787 = vmatpush1.bf16.msra.mxu1 %v4218_v2  ;;  %v4277_v1 = vld [vmem:[#allocation7 + $0x2a4] ss:$16 sps:$4 sm:$0xff]   ;;  %v4280_v2 = vld [vmem:[#allocation7 + $0x2ac] ss:$16 sps:$4 sm:$0xff]  }
 0x181   : > { %2706 = vmatprep.subr.bf16.mxu0 %v4223_v3  ;;  %2788 = vmatprep.subr.bf16.mxu1 %v4226_v4  ;;  %v4275_v3 = vld [vmem:[#allocation7 + $0x2a0] ss:$16 sps:$4 sm:$0xff]   ;;  %v4278_v4 = vld [vmem:[#allocation7 + $0x2a8] ss:$16 sps:$4 sm:$0xff]  }
 0x184   : > { %2707 = vmatpush1.bf16.msra.mxu0 %v4221_v5  ;;  %2789 = vmatpush1.bf16.msra.mxu1 %v4224_v6  ;;  %v4283_v5 = vld [vmem:[#allocation7 + $0x2c4] ss:$16 sps:$4 sm:$0xff]   ;;  %v4286_v6 = vld [vmem:[#allocation7 + $0x2cc] ss:$16 sps:$4 sm:$0xff]  }
 0x185   : > { %2708 = vmatprep.subr.bf16.mxu0 %v4229_v7  ;;  %2790 = vmatprep.subr.bf16.mxu1 %v4232_v8  ;;  %v4281_v7 = vld [vmem:[#allocation7 + $0x2c0] ss:$16 sps:$4 sm:$0xff]   ;;  %v4284_v8 = vld [vmem:[#allocation7 + $0x2c8] ss:$16 sps:$4 sm:$0xff]  }
 0x188   : > { %2709 = vmatpush1.bf16.msra.mxu0 %v4227_v9  ;;  %2791 = vmatpush1.bf16.msra.mxu1 %v4230_v10  ;;  %v4289_v9 = vld [vmem:[#allocation7 + $0x2e4] ss:$16 sps:$4 sm:$0xff]   ;;  %v4292_v10 = vld [vmem:[#allocation7 + $0x2ec] ss:$16 sps:$4 sm:$0xff]  }
 0x189   : > { %2710 = vmatprep.subr.bf16.mxu0 %v4235_v11  ;;  %2792 = vmatprep.subr.bf16.mxu1 %v4238_v12  ;;  %v4287_v11 = vld [vmem:[#allocation7 + $0x2e0] ss:$16 sps:$4 sm:$0xff]   ;;  %v4290_v12 = vld [vmem:[#allocation7 + $0x2e8] ss:$16 sps:$4 sm:$0xff]  }
 0x18c   : > { %2711 = vmatpush1.bf16.msra.mxu0 %v4233_v13  ;;  %2793 = vmatpush1.bf16.msra.mxu1 %v4236_v14  ;;  %v4295_v13 = vld [vmem:[#allocation7 + $0x304] ss:$16 sps:$4 sm:$0xff]   ;;  %v4298_v14 = vld [vmem:[#allocation7 + $0x30c] ss:$16 sps:$4 sm:$0xff]  }
 0x18d   : > { %2712 = vmatprep.subr.bf16.mxu0 %v4241_v15  ;;  %2794 = vmatprep.subr.bf16.mxu1 %v4244_v16  ;;  %v4293_v15 = vld [vmem:[#allocation7 + $0x300] ss:$16 sps:$4 sm:$0xff]   ;;  %v4296_v16 = vld [vmem:[#allocation7 + $0x308] ss:$16 sps:$4 sm:$0xff]  }
 0x190   : > { %2713 = vmatpush1.bf16.msra.mxu0 %v4239_v17  ;;  %2795 = vmatpush1.bf16.msra.mxu1 %v4242_v18  ;;  %v4301_v17 = vld [vmem:[#allocation7 + $0x324] ss:$16 sps:$4 sm:$0xff]   ;;  %v4304_v18 = vld [vmem:[#allocation7 + $0x32c] ss:$16 sps:$4 sm:$0xff]  }
 0x191   : > { %2723 = vmatprep.subr.bf16.mxu0 %v4247_v19  ;;  %2805 = vmatprep.subr.bf16.mxu1 %v4250_v20  ;;  %v4299_v19 = vld [vmem:[#allocation7 + $0x320] ss:$16 sps:$4 sm:$0xff]   ;;  %v4302_v20 = vld [vmem:[#allocation7 + $0x328] ss:$16 sps:$4 sm:$0xff]  }
 0x226   : > { %v1713_v30 = vpop.f32.mrb[0].mxu0  ;;  %v4847_v31 = vpop.f32.mrb[0].mxu1 }
 0x227   : > { %v3730_v32 = vadd.f32 %v1713_v30, %v555_v27  ;;  %v1715_v33 = vpop.f32.mrb[1].mxu0  ;;  %v1879_v34 = vpop.f32.mrb[1].mxu1  ;;  %v4310_v27 = vld [vmem:[#allocation7 + $0x34c] ss:$16 sps:$4 sm:$0xff]   ;;  %v4313_v30 = vld [vmem:[#allocation7 + $0x364] ss:$16 sps:$4 sm:$0xff]  }
 0x228   : > { %v3731_v35 = vadd.f32 %v1715_v33, %v559_v28  ;;  %v3733_v36 = vadd.f32 %v1879_v34, %v567_v29  ;;  %v1717_v37 = vpop.f32.mrb[2].mxu0  ;;  %v1881_v38 = vpop.f32.mrb[2].mxu1  ;;  %v4305_v28 = vld [vmem:[#allocation7 + $0x340] ss:$16 sps:$4 sm:$0xff]   ;;  %v4308_v29 = vld [vmem:[#allocation7 + $0x348] ss:$16 sps:$4 sm:$0xff]  }
 0x229   : > { %v1884_v39 = vmax.f32 %v3730_v32, 0.0  ;;  %v1718_v40 = vpop.f32.mrb[3].mxu0  ;;  %v1882_v41 = vpop.f32.mrb[3].mxu1  ;;  %v4316_v32 = vld [vmem:[#allocation7 + $0x36c] ss:$16 sps:$4 sm:$0xff]  }
 0x22a   : > { %v1885_v42 = vmax.f32 %v3731_v35, 0.0  ;;  %v1887_v43 = vmax.f32 %v3733_v36, 0.0  ;;  %v4311_v33 = vld [vmem:[#allocation7 + $0x360] ss:$16 sps:$4 sm:$0xff]   ;;  %v4314_v34 = vld [vmem:[#allocation7 + $0x368] ss:$16 sps:$4 sm:$0xff]  }
 0x22b   : > { %v1888_v47 = vpack.c.bf16 %v1884_v39, %v1884_v39  ;;  %v4319_v35 = vld [vmem:[#allocation7 + $0x384] ss:$16 sps:$4 sm:$0xff]   ;;  %v4322_v36 = vld [vmem:[#allocation7 + $0x38c] ss:$16 sps:$4 sm:$0xff]   ;;  %v4317_v37 = vld [vmem:[#allocation7 + $0x380] ss:$16 sps:$4 sm:$0xff]  }
 0x22c   : > { %v1889_v44 = vpack.c.bf16 %v1885_v42, %v1885_v42  ;;  %v1891_v50 = vpack.c.bf16 %v1887_v43, %v1887_v43  ;;  %v4320_v38 = vld [vmem:[#allocation7 + $0x388] ss:$16 sps:$4 sm:$0xff]   ;;  %v562_v39 = vsub.s32 2, %v4828_v22  ;;  %v4325_v40 = vld [vmem:[#allocation7 + $0x3a4] ss:$16 sps:$4 sm:$0xff]  }
 0x22d   : > { %v4328_v41 = vld [vmem:[#allocation7 + $0x3ac] ss:$16 sps:$4 sm:$0xff]   ;;  %v4323_v42 = vld [vmem:[#allocation7 + $0x3a0] ss:$16 sps:$4 sm:$0xff]   ;;  %v4326_v43 = vld [vmem:[#allocation7 + $0x3a8] ss:$16 sps:$4 sm:$0xff]  }
 0x22e   : > { %2714 = vmatprep.mubr.bf16.mxu0 %v1889_v44  ;;  %2796 = vmatprep.mubr.bf16.mxu1 %v1889_v44  ;;  %v563_v44 = vrot.slane %v4834_v24, %v562_v39  ;;  %v4341_v24 = vld [vmem:[#allocation8 + $0x40] sm:$0xff]  }
 0x22f   : > { %2715 = vmatmul.mubr.bf16.vlgmr.msra.gmra.mrb[4].mxu0 %v1888_v47  ;;  %2797 = vmatmul.mubr.bf16.vlgmr.msra.gmra.mrb[4].mxu1 %v1888_v47  ;;  %v4329_v47 = vld [vmem:[#allocation7 + $0x3c0] ss:$16 sps:$4 sm:$0xff]  }
 0x230   : > { %2724 = vmatpush1.bf16.msra.mxu0 %v4245_v45  ;;  %2806 = vmatpush1.bf16.msra.mxu1 %v4248_v46  ;;  %v4331_v45 = vld [vmem:[#allocation7 + $0x3c4] ss:$16 sps:$4 sm:$0xff]   ;;  %v4334_v46 = vld [vmem:[#allocation7 + $0x3cc] ss:$16 sps:$4 sm:$0xff]  }
 0x231   : > { %2755 = vmatprep.mubr.bf16.mxu0 %v1891_v50  ;;  %2837 = vmatprep.mubr.bf16.mxu1 %v1891_v50  ;;  %v4337_v50 = vld [vmem:[#allocation7 + $0x3e4] ss:$16 sps:$4 sm:$0xff]  }
 0x232   : > { %2725 = vmatprep.subr.bf16.mxu0 %v4253_v48  ;;  %2807 = vmatprep.subr.bf16.mxu1 %v4256_v49  ;;  %v4332_v48 = vld [vmem:[#allocation7 + $0x3c8] ss:$16 sps:$4 sm:$0xff]   ;;  %v3732_v49 = vadd.f32 %v4847_v31, %v563_v44 }
 0x233   : > { %v4345_v31 = vld [vmem:[#allocation8 + $0x48] sm:$0xff]  }
 0x234   : > { %2726 = vmatpush1.bf16.msra.mxu0 %v4251_v51  ;;  %2808 = vmatpush1.bf16.msra.mxu1 %v4254_v52  ;;  %v4340_v51 = vld [vmem:[#allocation7 + $0x3ec] ss:$16 sps:$4 sm:$0xff]   ;;  %v4335_v52 = vld [vmem:[#allocation7 + $0x3e0] ss:$16 sps:$4 sm:$0xff]  }
 0x235   : > { %2727 = vmatprep.subr.bf16.mxu0 %v4259_v53  ;;  %2809 = vmatprep.subr.bf16.mxu1 %v4262_v54  ;;  %v4338_v53 = vld [vmem:[#allocation7 + $0x3e8] ss:$16 sps:$4 sm:$0xff]   ;;  %v1886_v54 = vmax.f32 %v3732_v49, 0.0 }
 0x238   : > { %2728 = vmatpush1.bf16.msra.mxu0 %v4257_v55  ;;  %2810 = vmatpush1.bf16.msra.mxu1 %v4260_v56  ;;  %v4342_v55 = vld [vmem:[#allocation8 + $0xc0] sm:$0xff]  }
 0x239   : > { %2729 = vmatprep.subr.bf16.mxu0 %v4265_v57  ;;  %2811 = vmatprep.subr.bf16.mxu1 %v4268_v58  ;;  %v4343_v56 = vld [vmem:[#allocation8] sm:$0xff]   ;;  %v1890_v58 = vpack.c.bf16 %v1886_v54, %v1886_v54 }
 0x23a   : > { %v4344_v57 = vld [vmem:[#allocation8 + $0x80] sm:$0xff]  }
 0x23c   : > { %2730 = vmatpush1.bf16.msra.mxu0 %v4263_v59  ;;  %2812 = vmatpush1.bf16.msra.mxu1 %v4266_v60  ;;  %v4346_v59 = vld [vmem:[#allocation8 + $0xc8] sm:$0xff]  }
 0x23d   : > { %2731 = vmatprep.subr.bf16.mxu0 %v4271_v61  ;;  %2813 = vmatprep.subr.bf16.mxu1 %v4274_v62  ;;  %v4347_v60 = vld [vmem:[#allocation8 + $0x8] sm:$0xff]   ;;  %v4349_v62 = vld [vmem:[#allocation8 + $0x50] sm:$0xff]  }
 0x23e   : > { %v4348_v61 = vld [vmem:[#allocation8 + $0x88] sm:$0xff]  }
 0x240   : > { %2732 = vmatpush1.bf16.msra.mxu0 %v4269_v63  ;;  %2814 = vmatpush1.bf16.msra.mxu1 %v4272_v0  ;;  %v4350_v63 = vld [vmem:[#allocation8 + $0xd0] sm:$0xff]  }
 0x241   : > { %2733 = vmatprep.subr.bf16.mxu0 %v4277_v1  ;;  %2815 = vmatprep.subr.bf16.mxu1 %v4280_v2  ;;  %v4351_v0 = vld [vmem:[#allocation8 + $0x10] sm:$0xff]   ;;  %v4353_v2 = vld [vmem:[#allocation8 + $0x58] sm:$0xff]  }
 0x242   : > { %v4352_v1 = vld [vmem:[#allocation8 + $0x90] sm:$0xff]  }
 0x244   : > { %2734 = vmatpush1.bf16.msra.mxu0 %v4275_v3  ;;  %2816 = vmatpush1.bf16.msra.mxu1 %v4278_v4  ;;  %v4354_v3 = vld [vmem:[#allocation8 + $0xd8] sm:$0xff]  }
 0x245   : > { %2735 = vmatprep.subr.bf16.mxu0 %v4283_v5  ;;  %2817 = vmatprep.subr.bf16.mxu1 %v4286_v6  ;;  %v4355_v4 = vld [vmem:[#allocation8 + $0x18] sm:$0xff]   ;;  %v4357_v6 = vld [vmem:[#allocation8 + $0x60] sm:$0xff]  }
 0x246   : > { %v4356_v5 = vld [vmem:[#allocation8 + $0x98] sm:$0xff]  }
 0x248   : > { %2736 = vmatpush1.bf16.msra.mxu0 %v4281_v7  ;;  %2818 = vmatpush1.bf16.msra.mxu1 %v4284_v8  ;;  %v4358_v7 = vld [vmem:[#allocation8 + $0xe0] sm:$0xff]  }
 0x249   : > { %2737 = vmatprep.subr.bf16.mxu0 %v4289_v9  ;;  %2819 = vmatprep.subr.bf16.mxu1 %v4292_v10  ;;  %v4359_v8 = vld [vmem:[#allocation8 + $0x20] sm:$0xff]   ;;  %v4361_v10 = vld [vmem:[#allocation8 + $0x68] sm:$0xff]  }
 0x24a   : > { %v4360_v9 = vld [vmem:[#allocation8 + $0xa0] sm:$0xff]  }
 0x24c   : > { %2738 = vmatpush1.bf16.msra.mxu0 %v4287_v11  ;;  %2820 = vmatpush1.bf16.msra.mxu1 %v4290_v12  ;;  %v4362_v11 = vld [vmem:[#allocation8 + $0xe8] sm:$0xff]  }
 0x24d   : > { %2739 = vmatprep.subr.bf16.mxu0 %v4295_v13  ;;  %2821 = vmatprep.subr.bf16.mxu1 %v4298_v14  ;;  %v4363_v12 = vld [vmem:[#allocation8 + $0x28] sm:$0xff]   ;;  %v4365_v14 = vld [vmem:[#allocation8 + $0x70] sm:$0xff]  }
 0x24e   : > { %v4364_v13 = vld [vmem:[#allocation8 + $0xa8] sm:$0xff]  }
 0x250   : > { %2740 = vmatpush1.bf16.msra.mxu0 %v4293_v15  ;;  %2822 = vmatpush1.bf16.msra.mxu1 %v4296_v16  ;;  %v4366_v15 = vld [vmem:[#allocation8 + $0xf0] sm:$0xff]  }
 0x251   : > { %2741 = vmatprep.subr.bf16.mxu0 %v4301_v17  ;;  %2823 = vmatprep.subr.bf16.mxu1 %v4304_v18  ;;  %v4367_v16 = vld [vmem:[#allocation8 + $0x30] sm:$0xff]   ;;  %v4369_v18 = vld [vmem:[#allocation8 + $0x78] sm:$0xff]  }
 0x252   : > { %v4368_v17 = vld [vmem:[#allocation8 + $0xb0] sm:$0xff]  }
 0x254   : > { %2742 = vmatpush1.bf16.msra.mxu0 %v4299_v19  ;;  %2824 = vmatpush1.bf16.msra.mxu1 %v4302_v20  ;;  %v4370_v19 = vld [vmem:[#allocation8 + $0xf8] sm:$0xff]  }
 0x255   : > { %2743 = vmatprep.subr.bf16.mxu0 %v4307_v21  ;;  %2825 = vmatprep.subr.bf16.mxu1 %v4310_v27  ;;  %v4371_v20 = vld [vmem:[#allocation8 + $0x38] sm:$0xff]   ;;  %v2020_v27 = vld [vmem:[%s4921_s4] sm:$0xf] }
 0x256   : > { %v4372_v21 = vld [vmem:[#allocation8 + $0xb8] sm:$0xff]  }
 0x258   : > { %2744 = vmatpush1.bf16.msra.mxu0 %v4305_v28  ;;  %2826 = vmatpush1.bf16.msra.mxu1 %v4308_v29  ;;  %v2025_v28 = vrot.slane %v2020_v27, %v554_v23  ;;  %v2033_v29 = vrot.slane %v2020_v27, %v562_v39 }
 0x259   : > { %2745 = vmatprep.subr.bf16.mxu0 %v4313_v30  ;;  %2827 = vmatprep.subr.bf16.mxu1 %v4316_v32  ;;  %v2029_v30 = vrot.slane %v2020_v27, %v558_v25  ;;  %v2037_v32 = vrot.slane %v2020_v27, %v566_v26 }
 0x25c   : > { %2746 = vmatpush1.bf16.msra.mxu0 %v4311_v33  ;;  %2828 = vmatpush1.bf16.msra.mxu1 %v4314_v34 }
 0x25d   : > { %2747 = vmatprep.subr.bf16.mxu0 %v4319_v35  ;;  %2829 = vmatprep.subr.bf16.mxu1 %v4322_v36 }
 0x260   : > { %2748 = vmatpush1.bf16.msra.mxu0 %v4317_v37  ;;  %2830 = vmatpush1.bf16.msra.mxu1 %v4320_v38 }
 0x261   : > { %2749 = vmatprep.subr.bf16.mxu0 %v4325_v40  ;;  %2831 = vmatprep.subr.bf16.mxu1 %v4328_v41 }
 0x264   : > { %2750 = vmatpush1.bf16.msra.mxu0 %v4323_v42  ;;  %2832 = vmatpush1.bf16.msra.mxu1 %v4326_v43 }
 0x265   : > { %2751 = vmatprep.subr.bf16.mxu0 %v4331_v45  ;;  %2833 = vmatprep.subr.bf16.mxu1 %v4334_v46 }
 0x268   : > { %2752 = vmatpush1.bf16.msra.mxu0 %v4329_v47  ;;  %2834 = vmatpush1.bf16.msra.mxu1 %v4332_v48 }
 0x269   : > { %2753 = vmatprep.subr.bf16.mxu0 %v4337_v50  ;;  %2835 = vmatprep.subr.bf16.mxu1 %v4340_v51  ;;  %v3649_v51 = vld [vmem:[%s4923_s6] ss:$0 sm:$0xff] }
 0x26c   : > { %2754 = vmatpush1.bf16.msra.mxu0 %v4335_v52  ;;  %2836 = vmatpush1.bf16.msra.mxu1 %v4338_v53 }
 0x26d   : > { %3686 = vmatprep.subr.bf16.mxu0 %v4341_v24  ;;  %3708 = vmatprep.subr.bf16.mxu1 %v4342_v55 }
 0x26f   : > { %2756 = vmatmul.mubr.bf16.vlgmr.msra.gmra.mrb[4].mxu0 %v1890_v58  ;;  %2838 = vmatmul.mubr.bf16.vlgmr.msra.gmra.mrb[4].mxu1 %v1890_v58 }
 0x270   : > { %3687 = vmatpush3.bf16.msra.mxu0 %v4343_v56  ;;  %3709 = vmatpush3.bf16.msra.mxu1 %v4344_v57 }
 0x271   : > { %3688 = vmatprep.subr.bf16.mxu0 %v4345_v31  ;;  %3710 = vmatprep.subr.bf16.mxu1 %v4346_v59 }
 0x274   : > { %3689 = vmatpush3.bf16.msra.mxu0 %v4347_v60  ;;  %3711 = vmatpush3.bf16.msra.mxu1 %v4348_v61 }
 0x275   : > { %3690 = vmatprep.subr.bf16.mxu0 %v4349_v62  ;;  %3712 = vmatprep.subr.bf16.mxu1 %v4350_v63 }
 0x278   : > { %3691 = vmatpush3.bf16.msra.mxu0 %v4351_v0  ;;  %3713 = vmatpush3.bf16.msra.mxu1 %v4352_v1 }
 0x279   : > { %3692 = vmatprep.subr.bf16.mxu0 %v4353_v2  ;;  %3714 = vmatprep.subr.bf16.mxu1 %v4354_v3 }
 0x27c   : > { %3693 = vmatpush3.bf16.msra.mxu0 %v4355_v4  ;;  %3715 = vmatpush3.bf16.msra.mxu1 %v4356_v5 }
 0x27d   : > { %3694 = vmatprep.subr.bf16.mxu0 %v4357_v6  ;;  %3716 = vmatprep.subr.bf16.mxu1 %v4358_v7 }
 0x280   : > { %3695 = vmatpush3.bf16.msra.mxu0 %v4359_v8  ;;  %3717 = vmatpush3.bf16.msra.mxu1 %v4360_v9 }
 0x281   : > { %3696 = vmatprep.subr.bf16.mxu0 %v4361_v10  ;;  %3718 = vmatprep.subr.bf16.mxu1 %v4362_v11 }
 0x284   : > { %3697 = vmatpush3.bf16.msra.mxu0 %v4363_v12  ;;  %3719 = vmatpush3.bf16.msra.mxu1 %v4364_v13 }
 0x285   : > { %3698 = vmatprep.subr.bf16.mxu0 %v4365_v14  ;;  %3720 = vmatprep.subr.bf16.mxu1 %v4366_v15 }
 0x288   : > { %3699 = vmatpush3.bf16.msra.mxu0 %v4367_v16  ;;  %3721 = vmatpush3.bf16.msra.mxu1 %v4368_v17 }
 0x289   : > { %3700 = vmatprep.subr.bf16.mxu0 %v4369_v18  ;;  %3722 = vmatprep.subr.bf16.mxu1 %v4370_v19 }
 0x28c   : > { %3701 = vmatpush3.bf16.msra.mxu0 %v4371_v20  ;;  %3723 = vmatpush3.bf16.msra.mxu1 %v4372_v21 }
 0x342   : > { %v2757_v33 = vpop.f32.mrb[4].mxu0  ;;  %v2839_v34 = vpop.f32.mrb[4].mxu1 }
 0x343   : > { %v3734_v35 = vadd.f32 %v2757_v33, %v2025_v28  ;;  %v3736_v36 = vadd.f32 %v2839_v34, %v2033_v29  ;;  %v2759_v37 = vpop.f32.mrb[5].mxu0  ;;  %v2841_v38 = vpop.f32.mrb[5].mxu1 }
 0x344   : > { %v3735_v40 = vadd.f32 %v2759_v37, %v2029_v30  ;;  %v3737_v41 = vadd.f32 %v2841_v38, %v2037_v32  ;;  %v2761_v42 = vpop.f32.mrb[6].mxu0  ;;  %v2843_v23 = vpop.f32.mrb[6].mxu1 }
 0x345   : > { %v2846_v43 = vmax.f32 %v3734_v35, 0.0  ;;  %v2848_v44 = vmax.f32 %v3736_v36, 0.0  ;;  %v2762_v39 = vpop.f32.mrb[7].mxu0  ;;  %v2844_v45 = vpop.f32.mrb[7].mxu1 }
 0x346   : > { %v2847_v46 = vmax.f32 %v3735_v40, 0.0  ;;  %v2849_v25 = vmax.f32 %v3737_v41, 0.0 }
 0x347   : > { %v2850_v26 = vpack.c.bf16 %v2846_v43, %v2846_v43  ;;  %v2852_v48 = vpack.c.bf16 %v2848_v44, %v2848_v44 }
 0x348   : > { %v2851_v47 = vpack.c.bf16 %v2847_v46, %v2847_v46  ;;  %v2853_v22 = vpack.c.bf16 %v2849_v25, %v2849_v25 }
 0x34a   : > { %3149 = vmatprep.mubr.bf16.mxu0 %v2851_v47  ;;  %3189 = vmatprep.mubr.bf16.mxu1 %v2853_v22 }
 0x34b   : > { %3150 = vmatmul.mubr.bf16.vlgmr.msra.gmra.mrb[8].mxu0 %v2850_v26  ;;  %3190 = vmatmul.mubr.bf16.vlgmr.msra.gmra.mrb[8].mxu1 %v2852_v48 }
 0x41e   : > { %v3702_v49 = vpop.f32.mrb[8].mxu0  ;;  %v3724_v50 = vpop.f32.mrb[8].mxu1 }
 0x41f   : > { %v3703_v52 = vpop.f32.mrb[9].mxu0  ;;  %v3725_v53 = vpop.f32.mrb[9].mxu1 }
 0x420   : > { %v3704_v54 = vadd.f32 %v3703_v52, %v3702_v49  ;;  %v3726_v24 = vadd.f32 %v3725_v53, %v3724_v50  ;;  %v3705_v55 = vpop.f32.mrb[10].mxu0  ;;  %v3727_v56 = vpop.f32.mrb[10].mxu1 }
 0x421   : > { %v3706_v57 = vpop.f32.mrb[11].mxu0  ;;  %v3728_v58 = vpop.f32.mrb[11].mxu1 }
 0x422   : > { %v3152_v31 = vadd.f32 %v3704_v54, %v3649_v51 }
 0x424   : > { %v3192_v59 = vadd.f32 %v3726_v24, %v3152_v31 }
 0x426   : > { %3197 = vst [vmem:[%s338_s16] sm:$0xff] %v3192_v59 }
 0x427   : > { %4500 = shalt.err (!%p4497_p4)
}
 0x428   : > { %s4501_s15 = scalar_lea.hbm %s4873_s21, 128  ;;  %s4505_s13 = scalar_lea.hbm %s4924_s7, 256 }
 0x429   : > { %p4502_p0 = scmp.ne.s32.totalorder %s4873_s21, %s4501_s15  ;;  %p4506_p8 = scmp.lt.u32.totalorder %s4873_s21, %s4924_s7 }
 0x42a   : > { %p4507_p13 = scmp.lt.u32.totalorder %s4505_s13, %s4501_s15  ;;  %p4509_p10 = scmp.lt.u32.totalorder %s4501_s15, %s4873_s21 }
 0x42b   : > { %p4503_p9 = pnand %p4502_p0, %p4758_p5 }
 0x42c   : > { %p4508_p6 = por %p4507_p13, %p4506_p8 }
 0x42d   : > { %p4504_p11 = pneg %p4503_p9 }
 0x42e   : > { %p4510_p3 = por %p4509_p10, %p4508_p6 }
 0x430   : > { %p4511_p7 = pnand %p4510_p3, %p4504_p11 }
 0x432   : > { %4514 = shalt.err (!%p4511_p7)
}
 0x433   : > { %3787 = dma.vmem_to_hbm [thread:$0]  (%p4758_p5), %s4875_s14, 128, %s4873_s21, %s3199_s29  }
 0x434 PF: > { %s4944_s16 = sld [smem:[#allocation15_spill]]  ;;  %s3224_s17 = sand.u32 1, %s4549_s24  }
 0x435   : > { %p4946_p2 = scmp.ge.s32.totalorder %s4561_s27, 2  ;;  %s3225_s18 = scalar_lea.sflag [#allocation4], %s3224_s17 }
 0x43a   : > { %p4945_p12 = scmp.ne.s32.totalorder %s4944_s16, 0 }
 0x43c   : > { %p3804_p1 = pnand %p4946_p2, %p4945_p12 }
 0x43e   : > { %4544 = dma.done.wait (!%p3804_p1), %s3225_s18, 128  }
 0x43f   : > { %4546 = vsyncadd (!%p3804_p1), %s3225_s18, 4294967168  ;;  %p22_p4 = scmp.ge.s32.totalorder %s4744_s8, 4   ;;  %s4947_s24 = smov %s4553_s25 }
 0x440   : > { %s4948_s25 = smov %s4557_s26  ;;  %s4949_s26 = smov %s4754_s19 }
 0x441   : > { %s4950_s27 = smov %s4744_s8  ;;  %24 = sbr.rel (!%p22_p4) target bundleno = 7 (0x7), region = 105 }
 0x448   :  { %3230 = vsyncpa [#allocation3], 1 }
 0x449   :  { %3232 = vsyncpa [#allocation3 + $0x1], 1 }
 0x44a   :  { %3233 = vsyncpa [#allocation6], 1 }
 0x44b   :  { %3234 = vsyncpa [#allocation9], 1 }
 0x44c   :  { %3235 = vsyncpa [#allocation4], 1 }
 0x44d   :  { %3237 = vsyncpa [#allocation4 + $0x1], 1 }

</bundles_post_ra>
